<compile_context>
chip_gen: v7x
topology: tpu7x:2x2x1
jax: 0.10.0
libtpu: 0.0.40
codegen_flags: <defaults>
</compile_context>

<pallas_src>
import numpy as np
import jax
import jax.numpy as jnp
from jax.experimental import pallas as pl
from jax.experimental.pallas import tpu as pltpu

_INV_SQRT2 = np.float32(1.0 / np.sqrt(2.0))
_SQRT_2_OVER_PI = np.float32(0.7978845608028654)
_LN_EPS = np.float32(1e-5)            # nn.LayerNorm default eps
_LANE = 128                           # TPU lane width
_TB_CAP = 512                         # max batch-tile rows (review: 256-512)

MATMUL_DTYPE = jnp.bfloat16           # matmul operand dtype (f32 accumulation)
OUT_DTYPE = jnp.float32               # bf16 halves vst/HBM writeback on v5e
GELU_APPROX = False                   # True -> tanh-approx GELU (EUP, not VPU erf)


# ----------------------------------------------------------------------------
# Batch-tile selection: multiples of 8, capped, and >=2 grid steps once the
# batch reaches 16 so v7x's two TensorCores both get work ("parallel" axis).
# ----------------------------------------------------------------------------
def _choose_tb(bsz, cap=_TB_CAP):
    rows = 8 * ((max(int(bsz), 1) + 7) // 8)
    if rows <= 8:
        return 8
    n_tiles = max(2, (rows + cap - 1) // cap)
    tb = (rows + n_tiles - 1) // n_tiles
    return min(cap, 8 * ((tb + 7) // 8))


# ----------------------------------------------------------------------------
# Fully fused forward kernel.
# cfg: static tuple of (d_out, use_ln, affine, act, save_res, add_res, tag).
# ----------------------------------------------------------------------------
def _build_kernel(cfg, P, d_in, enc_dim, dec_dim, gelu_approx=None):
    if gelu_approx is None:
        gelu_approx = GELU_APPROX

    def kernel(x_ref, w_ref, p_ref, enc_ref, dec_ref):
        # One (1, P) lane-index vreg; broadcast into the masked-LN where()s.
        lane = jax.lax.broadcasted_iota(jnp.int32, (1, P), 1)
        h = x_ref[...]                                        # (TB, d_in) f32
        res = None
        for li, (d_out, use_ln, affine, act, save_res, add_res, tag) in enumerate(cfg):
            if save_res:                                      # ResidualBlock input
                res = h

            w = w_ref[li]                                     # (P, P) bf16
            if li == 0 and d_in != P:
                # Padded K rows of the stored weight are zero; use only the
                # first d_in rows so x never needs lane-padding.
                w = w[:d_in, :]
            acc = jnp.dot(h.astype(w.dtype), w,
                          preferred_element_type=jnp.float32)  # MXU, f32 acc
            acc = acc + p_ref[li, 0:1, :]                      # bias row

            if use_ln:
                # LayerNorm stats over the d_out REAL lanes only.
                inv_d = np.float32(1.0 / d_out)
                if d_out == P:
                    mu = jnp.sum(acc, axis=-1, keepdims=True) * inv_d
                    cen = acc - mu
                else:
                    m = lane < d_out                           # (1, P), broadcasts
                    mu = jnp.sum(jnp.where(m, acc, 0.0), axis=-1,
                                 keepdims=True) * inv_d
                    cen = jnp.where(m, acc - mu, 0.0)
                var = jnp.sum(cen * cen, axis=-1, keepdims=True) * inv_d
                acc = cen * jax.lax.rsqrt(var + _LN_EPS)
                if affine:                                     # padded g/be are 0
                    acc = acc * p_ref[li, 1:2, :] + p_ref[li, 2:3, :]

            if act == "gelu":
                if gelu_approx:      # tanh-approx -> EUP slot instead of VPU erf
                    acc = 0.5 * acc * (1.0 + jnp.tanh(
                        _SQRT_2_OVER_PI * (acc + np.float32(0.044715) * acc * acc * acc)))
                else:                # exact erf GELU (nn.GELU() default)
                    acc = 0.5 * acc * (1.0 + jax.lax.erf(acc * _INV_SQRT2))
            elif act == "tanh":
                acc = jnp.tanh(acc)
            elif act == "sigmoid":
                acc = jax.nn.sigmoid(acc)

            if add_res:                                       # ResidualBlock output
                acc = acc + res
            h = acc
            if tag == "enc":                                  # real-width store
                enc_ref[...] = h[:, :enc_dim].astype(enc_ref.dtype)
        dec_ref[...] = h[:, :dec_dim].astype(dec_ref.dtype)   # real-width store

    return kernel


def build_forward(cfg, d_in, enc_dim, dec_dim):
    """Returns forward(x, W, par) -> (encoded, decoded) via one pallas_call."""
    n_layers = len(cfg)

    def forward(x, W, par):
        Bsz = x.shape[0]
        P = W.shape[-1]
        assert W.shape[0] == n_layers and x.shape[1] == d_in
        TB = _choose_tb(Bsz)
        grid = (pl.cdiv(Bsz, TB),)

        enc, dec = pl.pallas_call(
            _build_kernel(cfg, P, d_in, enc_dim, dec_dim),
            grid=grid,
            in_specs=[
                pl.BlockSpec((TB, d_in), lambda i: (i, 0)),               # x (real width)
                pl.BlockSpec((n_layers, P, P), lambda i: (0, 0, 0)),      # weight stack
                pl.BlockSpec((n_layers, 8, P), lambda i: (0, 0, 0)),      # bias/gamma/beta slab
            ],
            out_specs=(
                pl.BlockSpec((TB, enc_dim), lambda i: (i, 0)),
                pl.BlockSpec((TB, dec_dim), lambda i: (i, 0)),
            ),
            out_shape=(
                jax.ShapeDtypeStruct((Bsz, enc_dim), OUT_DTYPE),
                jax.ShapeDtypeStruct((Bsz, dec_dim), OUT_DTYPE),
            ),
            compiler_params=pltpu.CompilerParams(
                dimension_semantics=("parallel",),       # batch axis -> dual-TC on v7x
                vmem_limit_bytes=32 * 1024 * 1024,
            ),
        )(x, W, par)
        return enc, dec

    return forward


# ----------------------------------------------------------------------------
# Deterministic parameter construction (mirrors the PyTorch module's layers)
# ----------------------------------------------------------------------------
def _dense(key, din, dout):
    k1, k2 = jax.random.split(key)
    w = jax.random.normal(k1, (din, dout), jnp.float32) * np.float32(1.0 / np.sqrt(din))
    b = jax.random.normal(k2, (dout,), jnp.float32) * 0.01
    return w, b


def _ln_params(key, d):
    k1, k2 = jax.random.split(key)
    return (1.0 + 0.02 * jax.random.normal(k1, (d,), jnp.float32),
            0.02 * jax.random.normal(k2, (d,), jnp.float32))


def init_params(key, input_size, embedding_size, hidden_size):
    H, H2, E = hidden_size, hidden_size * 2, embedding_size
    keys = iter(jax.random.split(key, 64))
    p = {}
    # encoder
    p["eW1"], p["eb1"] = _dense(next(keys), input_size, H2)
    p["eg1"], p["ebe1"] = _ln_params(next(keys), H2)
    p["eW2"], p["eb2"] = _dense(next(keys), H2, H)
    p["eg2"], p["ebe2"] = _ln_params(next(keys), H)
    p["erW1"], p["erb1"] = _dense(next(keys), H, H)      # ResidualBlock
    p["erg1"], p["erbe1"] = _ln_params(next(keys), H)
    p["erW2"], p["erb2"] = _dense(next(keys), H, H)
    p["erg2"], p["erbe2"] = _ln_params(next(keys), H)
    p["eWv"], p["ebv"] = _dense(next(keys), H, H)        # MHA v_proj (q/k don't
    p["eWo"], p["ebo"] = _dense(next(keys), H, H)        #  matter at seq len 1)
    p["eag"], p["eabe"] = _ln_params(next(keys), H)
    p["eW3"], p["eb3"] = _dense(next(keys), H, E)
    p["eg3"], p["ebe3"] = _ln_params(next(keys), E)
    # decoder
    p["dW1"], p["db1"] = _dense(next(keys), E, H)
    p["dg1"], p["dbe1"] = _ln_params(next(keys), H)
    p["drW1"], p["drb1"] = _dense(next(keys), H, H)
    p["drg1"], p["drbe1"] = _ln_params(next(keys), H)
    p["drW2"], p["drb2"] = _dense(next(keys), H, H)
    p["drg2"], p["drbe2"] = _ln_params(next(keys), H)
    p["dWv"], p["dbv"] = _dense(next(keys), H, H)
    p["dWo"], p["dbo"] = _dense(next(keys), H, H)
    p["dag"], p["dabe"] = _ln_params(next(keys), H)
    p["dW2"], p["db2"] = _dense(next(keys), H, H2)
    p["dg2"], p["dbe2"] = _ln_params(next(keys), H2)
    p["dW3"], p["db3"] = _dense(next(keys), H2, input_size)
    return p


def build_model(p, input_size, embedding_size, hidden_size):
    """Fold the seq-len-1 attention and the attention-LN affines, zero-pad every
    feature dim to 128 lanes, and pack the 12 fused layers into one bf16 weight
    stack plus one (L,8,128) f32 bias/gamma/beta slab and a static config."""
    H, H2, E = hidden_size, 2 * hidden_size, embedding_size

    # SelfAttention at sequence length 1: softmax over one key == 1.0, so the
    # block is exactly LayerNorm(out_proj(v_proj(x))) -> fold the two linears.
    eWa = p["eWv"] @ p["eWo"]
    eba = p["ebv"] @ p["eWo"] + p["ebo"]
    dWa = p["dWv"] @ p["dWo"]
    dba = p["dbv"] @ p["dWo"] + p["dbo"]

    def L(w, b, g, be, d_out, use_ln, act, save=False, add=False, tag=None, affine=None):
        if affine is None:
            affine = use_ln
        return (w, b, g, be), (d_out, use_ln, affine, act, save, add, tag)

    ref_spec = [
        # encoder
        L(p["eW1"], p["eb1"], p["eg1"], p["ebe1"], H2, True, "gelu"),
        L(p["eW2"], p["eb2"], p["eg2"], p["ebe2"], H, True, "gelu"),
        L(p["erW1"], p["erb1"], p["erg1"], p["erbe1"], H, True, "gelu", save=True),
        L(p["erW2"], p["erb2"], p["erg2"], p["erbe2"], H, True, "none", add=True),
        L(eWa, eba, p["eag"], p["eabe"], H, True, "none"),
        L(p["eW3"], p["eb3"], p["eg3"], p["ebe3"], E, True, "tanh", tag="enc"),
        # decoder
        L(p["dW1"], p["db1"], p["dg1"], p["dbe1"], H, True, "gelu"),
        L(p["drW1"], p["drb1"], p["drg1"], p["drbe1"], H, True, "gelu", save=True),
        L(p["drW2"], p["drb2"], p["drg2"], p["drbe2"], H, True, "none", add=True),
        L(dWa, dba, p["dag"], p["dabe"], H, True, "none"),
        L(p["dW2"], p["db2"], p["dg2"], p["dbe2"], H2, True, "gelu"),
        L(p["dW3"], p["db3"], None, None, input_size, False, "sigmoid", tag="dec"),
    ]
    ref_layers = [s[0] for s in ref_spec]
    ref_cfg = tuple(s[1] for s in ref_spec)

    # Fold the affine of the act="none", non-residual attention LNs (idx 4, 9)
    # into the next layer:  LN_aff(z)@W + b == LN_noaff(z)@(diag(g)W) + (be@W+b).
    kern_layers = [list(l) for l in ref_layers]
    kern_cfg = [list(c) for c in ref_cfg]
    for ln_i in (4, 9):
        nxt = ln_i + 1
        g, be = kern_layers[ln_i][2], kern_layers[ln_i][3]
        Wn, bn = kern_layers[nxt][0], kern_layers[nxt][1]
        kern_layers[nxt][0] = g[:, None] * Wn
        kern_layers[nxt][1] = be @ Wn + bn
        kern_layers[ln_i][2] = None
        kern_layers[ln_i][3] = None
        kern_cfg[ln_i][2] = False                       # affine off
    kern_cfg = tuple(tuple(c) for c in kern_cfg)

    # P stays at 128 lanes (do NOT pad to 256 to "fill" the wide MXUs).
    P = _LANE * ((max(input_size, E, H, H2) + _LANE - 1) // _LANE)

    def pad_w(w):
        return jnp.zeros((P, P), jnp.float32).at[: w.shape[0], : w.shape[1]].set(w)

    def pack_par(b, g, be):                             # one (8,P) slab per layer
        s = jnp.zeros((8, P), jnp.float32)
        s = s.at[0, : b.shape[0]].set(b)                # row 0: bias
        if g is not None:
            s = s.at[1, : g.shape[0]].set(g)            # row 1: LN gamma
            s = s.at[2, : be.shape[0]].set(be)          # row 2: LN beta
        return s

    packed = dict(
        W=jnp.stack([pad_w(w) for (w, b, g, be) in kern_layers]).astype(MATMUL_DTYPE),
        par=jnp.stack([pack_par(b, g, be) for (w, b, g, be) in kern_layers]),
    )
    return packed, kern_cfg, kern_layers, ref_layers, ref_cfg


# ----------------------------------------------------------------------------
# Pure-JAX reference (same layer sequence on unpadded params).
# ----------------------------------------------------------------------------
def ref_forward(x, layers, cfg, matmul_dtype=MATMUL_DTYPE, gelu_approx=None):
    if gelu_approx is None:
        gelu_approx = GELU_APPROX
    h, res, enc = x, None, None
    for (w, b, g, be), (d_out, use_ln, affine, act, save, add, tag) in zip(layers, cfg):
        if save:
            res = h
        a = jnp.dot(h.astype(matmul_dtype), w.astype(matmul_dtype),
                    preferred_element_type=jnp.float32) + b
        if use_ln:
            mu = jnp.mean(a, axis=-1, keepdims=True)
            var = jnp.mean(jnp.square(a - mu), axis=-1, keepdims=True)
            a = (a - mu) * jax.lax.rsqrt(var + _LN_EPS)
            if affine:
                a = a * g + be
        if act == "gelu":
            if gelu_approx:
                a = 0.5 * a * (1.0 + jnp.tanh(
                    _SQRT_2_OVER_PI * (a + np.float32(0.044715) * a * a * a)))
            else:
                a = 0.5 * a * (1.0 + jax.lax.erf(a * _INV_SQRT2))
        elif act == "tanh":
            a = jnp.tanh(a)
        elif act == "sigmoid":
            a = jax.nn.sigmoid(a)
        if add:
            a = a + res
        h = a
        if tag == "enc":
            enc = h
    return enc, h


if __name__ == "__main__":
    # Small shapes consistent with the module: x is (batch, input_size).
    BATCH = 8
    INPUT_SIZE = 64
    HIDDEN_SIZE = 64       # hidden*2 = 128; divisible by the 8 attention heads
    EMBEDDING_SIZE = 32

    key = jax.random.PRNGKey(0)
    kx, kp = jax.random.split(key)
    x = jax.random.normal(kx, (BATCH, INPUT_SIZE), jnp.float32)

    raw = init_params(kp, INPUT_SIZE, EMBEDDING_SIZE, HIDDEN_SIZE)
    packed, kern_cfg, kern_layers, ref_layers, ref_cfg = build_model(
        raw, INPUT_SIZE, EMBEDDING_SIZE, HIDDEN_SIZE)

    fwd = jax.jit(build_forward(kern_cfg, INPUT_SIZE, EMBEDDING_SIZE, INPUT_SIZE))
    encoded, decoded = fwd(x, packed["W"], packed["par"])
    jax.block_until_ready((encoded, decoded))

    assert encoded.shape == (BATCH, EMBEDDING_SIZE)
    assert decoded.shape == (BATCH, INPUT_SIZE)

    # Tight check: kernel vs a JAX reference using the SAME folded params and
    # matmul dtype (validates the Pallas implementation itself).
    enc_t, dec_t = ref_forward(x, kern_layers, kern_cfg)
    np.testing.assert_allclose(np.asarray(encoded), np.asarray(enc_t),
                               rtol=5e-3, atol=5e-3)
    np.testing.assert_allclose(np.asarray(decoded), np.asarray(dec_t),
                               rtol=5e-3, atol=5e-3)

    # Loose check: bf16-matmul kernel vs the exact f32, unfolded module math
    # (validates the attention and LN-affine folds end-to-end).
    enc_f, dec_f = ref_forward(x, ref_layers, ref_cfg, matmul_dtype=jnp.float32)
    np.testing.assert_allclose(np.asarray(encoded), np.asarray(enc_f),
                               rtol=3e-2, atol=3e-2)
    np.testing.assert_allclose(np.asarray(decoded), np.asarray(dec_f),
                               rtol=3e-2, atol=3e-2)
    print("KERNEL_OK")
</pallas_src>

<mosaic_0001>
module attributes {stable_mosaic.version = 11 : i64} {
  func.func @kernel(%arg0: i32, %arg1: memref<8x64xf32, #tpu.memory_space<vmem>>, %arg2: memref<12x128x128xbf16, #tpu.memory_space<vmem>>, %arg3: memref<12x8x128xf32, #tpu.memory_space<vmem>>, %arg4: memref<8x32xf32, #tpu.memory_space<vmem>>, %arg5: memref<8x64xf32, #tpu.memory_space<vmem>>) attributes {dimension_semantics = [#tpu.dimension_semantics<parallel>], iteration_bounds = array<i64: 1>, scalar_prefetch = 0 : i64, scratch_operands = 0 : i64, tpu.core_type = #tpu.core_type<tc>, window_params = [{transform_indices = @transform_0, window_bounds = array<i64: 8, 64>}, {pipeline_mode = #tpu.pipeline_mode<synchronous>, transform_indices = @transform_1, window_bounds = array<i64: 12, 128, 128>}, {pipeline_mode = #tpu.pipeline_mode<synchronous>, transform_indices = @transform_2, window_bounds = array<i64: 12, 8, 128>}, {transform_indices = @transform_3, window_bounds = array<i64: 8, 32>}, {transform_indices = @transform_4, window_bounds = array<i64: 8, 64>}]} {
    %0 = tpu.iota {dimensions = array<i32: 1>} : vector<1x128xi32>
    %c0 = arith.constant 0 : index
    %c0_0 = arith.constant 0 : index
    %1 = vector.load %arg1[%c0, %c0_0] : memref<8x64xf32, #tpu.memory_space<vmem>>, vector<8x64xf32>
    %c0_1 = arith.constant 0 : index
    %c0_2 = arith.constant 0 : index
    %c0_3 = arith.constant 0 : index
    %2 = vector.load %arg2[%c0_1, %c0_2, %c0_3] : memref<12x128x128xbf16, #tpu.memory_space<vmem>>, vector<1x128x128xbf16>
    %3 = vector.shape_cast %2 : vector<1x128x128xbf16> to vector<128x128xbf16>
    %4 = vector.extract_strided_slice %3 {offsets = [0, 0], sizes = [64, 128], strides = [1, 1]} : vector<128x128xbf16> to vector<64x128xbf16>
    %5 = arith.truncf %1 : vector<8x64xf32> to vector<8x64xbf16>
    %cst = arith.constant dense<0.000000e+00> : vector<8x128xf32>
    %6 = tpu.matmul %5, %4, %cst {dimension_numbers = #tpu.dot_dimension_numbers<[1], [0], [0], [1], [0, 0, 1, 1], [], []>} : vector<8x64xbf16>, vector<64x128xbf16>, vector<8x128xf32> -> vector<8x128xf32>
    %c0_4 = arith.constant 0 : index
    %c0_5 = arith.constant 0 : index
    %c0_6 = arith.constant 0 : index
    %7 = vector.load %arg3[%c0_4, %c0_5, %c0_6] : memref<12x8x128xf32, #tpu.memory_space<vmem>>, vector<1x1x128xf32>
    %8 = vector.shape_cast %7 : vector<1x1x128xf32> to vector<1x128xf32>
    %9 = vector.broadcast %8 : vector<1x128xf32> to vector<8x128xf32>
    %10 = arith.addf %6, %9 : vector<8x128xf32>
    %cst_7 = arith.constant dense<0.000000e+00> : vector<8xf32>
    %11 = vector.multi_reduction <add>, %10, %cst_7 [1] : vector<8x128xf32> to vector<8xf32>
    %12 = vector.shape_cast %11 : vector<8xf32> to vector<8x1xf32>
    %cst_8 = arith.constant 7.812500e-03 : f32
    %13 = vector.broadcast %cst_8 : f32 to vector<8x1xf32>
    %14 = arith.mulf %12, %13 : vector<8x1xf32>
    %15 = vector.broadcast %14 : vector<8x1xf32> to vector<8x128xf32>
    %16 = arith.subf %10, %15 : vector<8x128xf32>
    %17 = arith.mulf %16, %16 : vector<8x128xf32>
    %cst_9 = arith.constant dense<0.000000e+00> : vector<8xf32>
    %18 = vector.multi_reduction <add>, %17, %cst_9 [1] : vector<8x128xf32> to vector<8xf32>
    %19 = vector.shape_cast %18 : vector<8xf32> to vector<8x1xf32>
    %cst_10 = arith.constant 7.812500e-03 : f32
    %20 = vector.broadcast %cst_10 : f32 to vector<8x1xf32>
    %21 = arith.mulf %19, %20 : vector<8x1xf32>
    %cst_11 = arith.constant 9.99999974E-6 : f32
    %22 = vector.broadcast %cst_11 : f32 to vector<8x1xf32>
    %23 = arith.addf %21, %22 : vector<8x1xf32>
    %24 = math.rsqrt %23 : vector<8x1xf32>
    %25 = vector.broadcast %24 : vector<8x1xf32> to vector<8x128xf32>
    %26 = arith.mulf %16, %25 : vector<8x128xf32>
    %c0_12 = arith.constant 0 : index
    %c1 = arith.constant 1 : index
    %c0_13 = arith.constant 0 : index
    %27 = vector.load %arg3[%c0_12, %c1, %c0_13] : memref<12x8x128xf32, #tpu.memory_space<vmem>>, vector<1x1x128xf32>
    %28 = vector.shape_cast %27 : vector<1x1x128xf32> to vector<1x128xf32>
    %29 = vector.broadcast %28 : vector<1x128xf32> to vector<8x128xf32>
    %30 = arith.mulf %26, %29 : vector<8x128xf32>
    %c0_14 = arith.constant 0 : index
    %c2 = arith.constant 2 : index
    %c0_15 = arith.constant 0 : index
    %31 = vector.load %arg3[%c0_14, %c2, %c0_15] : memref<12x8x128xf32, #tpu.memory_space<vmem>>, vector<1x1x128xf32>
    %32 = vector.shape_cast %31 : vector<1x1x128xf32> to vector<1x128xf32>
    %33 = vector.broadcast %32 : vector<1x128xf32> to vector<8x128xf32>
    %34 = arith.addf %30, %33 : vector<8x128xf32>
    %cst_16 = arith.constant 5.000000e-01 : f32
    %35 = vector.broadcast %cst_16 : f32 to vector<8x128xf32>
    %36 = arith.mulf %35, %34 : vector<8x128xf32>
    %cst_17 = arith.constant 0.707106769 : f32
    %37 = vector.broadcast %cst_17 : f32 to vector<8x128xf32>
    %38 = arith.mulf %34, %37 : vector<8x128xf32>
    %39 = math.erf %38 : vector<8x128xf32>
    %cst_18 = arith.constant 1.000000e+00 : f32
    %40 = vector.broadcast %cst_18 : f32 to vector<8x128xf32>
    %41 = arith.addf %40, %39 : vector<8x128xf32>
    %42 = arith.mulf %36, %41 : vector<8x128xf32>
    %c1_19 = arith.constant 1 : index
    %c0_20 = arith.constant 0 : index
    %c0_21 = arith.constant 0 : index
    %43 = vector.load %arg2[%c1_19, %c0_20, %c0_21] : memref<12x128x128xbf16, #tpu.memory_space<vmem>>, vector<1x128x128xbf16>
    %44 = vector.shape_cast %43 : vector<1x128x128xbf16> to vector<128x128xbf16>
    %45 = arith.truncf %42 : vector<8x128xf32> to vector<8x128xbf16>
    %cst_22 = arith.constant dense<0.000000e+00> : vector<8x128xf32>
    %46 = tpu.matmul %45, %44, %cst_22 {dimension_numbers = #tpu.dot_dimension_numbers<[1], [0], [0], [1], [0, 0, 1, 1], [], []>} : vector<8x128xbf16>, vector<128x128xbf16>, vector<8x128xf32> -> vector<8x128xf32>
    %c1_23 = arith.constant 1 : index
    %c0_24 = arith.constant 0 : index
    %c0_25 = arith.constant 0 : index
    %47 = vector.load %arg3[%c1_23, %c0_24, %c0_25] : memref<12x8x128xf32, #tpu.memory_space<vmem>>, vector<1x1x128xf32>
    %48 = vector.shape_cast %47 : vector<1x1x128xf32> to vector<1x128xf32>
    %49 = vector.broadcast %48 : vector<1x128xf32> to vector<8x128xf32>
    %50 = arith.addf %46, %49 : vector<8x128xf32>
    %c64_i32 = arith.constant 64 : i32
    %51 = vector.broadcast %c64_i32 : i32 to vector<1x128xi32>
    %52 = arith.cmpi slt, %0, %51 : vector<1x128xi32>
    %cst_26 = arith.constant 0.000000e+00 : f32
    %53 = vector.shape_cast %52 : vector<1x128xi1> to vector<1x128xi1>
    %54 = vector.broadcast %53 : vector<1x128xi1> to vector<8x128xi1>
    %55 = vector.broadcast %cst_26 : f32 to vector<8x128xf32>
    %56 = arith.select %54, %50, %55 : vector<8x128xi1>, vector<8x128xf32>
    %cst_27 = arith.constant dense<0.000000e+00> : vector<8xf32>
    %57 = vector.multi_reduction <add>, %56, %cst_27 [1] : vector<8x128xf32> to vector<8xf32>
    %58 = vector.shape_cast %57 : vector<8xf32> to vector<8x1xf32>
    %cst_28 = arith.constant 1.562500e-02 : f32
    %59 = vector.broadcast %cst_28 : f32 to vector<8x1xf32>
    %60 = arith.mulf %58, %59 : vector<8x1xf32>
    %61 = vector.broadcast %60 : vector<8x1xf32> to vector<8x128xf32>
    %62 = arith.subf %50, %61 : vector<8x128xf32>
    %cst_29 = arith.constant 0.000000e+00 : f32
    %63 = vector.shape_cast %52 : vector<1x128xi1> to vector<1x128xi1>
    %64 = vector.broadcast %63 : vector<1x128xi1> to vector<8x128xi1>
    %65 = vector.broadcast %cst_29 : f32 to vector<8x128xf32>
    %66 = arith.select %64, %62, %65 : vector<8x128xi1>, vector<8x128xf32>
    %67 = arith.mulf %66, %66 : vector<8x128xf32>
    %cst_30 = arith.constant dense<0.000000e+00> : vector<8xf32>
    %68 = vector.multi_reduction <add>, %67, %cst_30 [1] : vector<8x128xf32> to vector<8xf32>
    %69 = vector.shape_cast %68 : vector<8xf32> to vector<8x1xf32>
    %cst_31 = arith.constant 1.562500e-02 : f32
    %70 = vector.broadcast %cst_31 : f32 to vector<8x1xf32>
    %71 = arith.mulf %69, %70 : vector<8x1xf32>
    %cst_32 = arith.constant 9.99999974E-6 : f32
    %72 = vector.broadcast %cst_32 : f32 to vector<8x1xf32>
    %73 = arith.addf %71, %72 : vector<8x1xf32>
    %74 = math.rsqrt %73 : vector<8x1xf32>
    %75 = vector.broadcast %74 : vector<8x1xf32> to vector<8x128xf32>
    %76 = arith.mulf %66, %75 : vector<8x128xf32>
    %c1_33 = arith.constant 1 : index
    %c1_34 = arith.constant 1 : index
    %c0_35 = arith.constant 0 : index
    %77 = vector.load %arg3[%c1_33, %c1_34, %c0_35] : memref<12x8x128xf32, #tpu.memory_space<vmem>>, vector<1x1x128xf32>
    %78 = vector.shape_cast %77 : vector<1x1x128xf32> to vector<1x128xf32>
    %79 = vector.broadcast %78 : vector<1x128xf32> to vector<8x128xf32>
    %80 = arith.mulf %76, %79 : vector<8x128xf32>
    %c1_36 = arith.constant 1 : index
    %c2_37 = arith.constant 2 : index
    %c0_38 = arith.constant 0 : index
    %81 = vector.load %arg3[%c1_36, %c2_37, %c0_38] : memref<12x8x128xf32, #tpu.memory_space<vmem>>, vector<1x1x128xf32>
    %82 = vector.shape_cast %81 : vector<1x1x128xf32> to vector<1x128xf32>
    %83 = vector.broadcast %82 : vector<1x128xf32> to vector<8x128xf32>
    %84 = arith.addf %80, %83 : vector<8x128xf32>
    %cst_39 = arith.constant 5.000000e-01 : f32
    %85 = vector.broadcast %cst_39 : f32 to vector<8x128xf32>
    %86 = arith.mulf %85, %84 : vector<8x128xf32>
    %cst_40 = arith.constant 0.707106769 : f32
    %87 = vector.broadcast %cst_40 : f32 to vector<8x128xf32>
    %88 = arith.mulf %84, %87 : vector<8x128xf32>
    %89 = math.erf %88 : vector<8x128xf32>
    %cst_41 = arith.constant 1.000000e+00 : f32
    %90 = vector.broadcast %cst_41 : f32 to vector<8x128xf32>
    %91 = arith.addf %90, %89 : vector<8x128xf32>
    %92 = arith.mulf %86, %91 : vector<8x128xf32>
    %c2_42 = arith.constant 2 : index
    %c0_43 = arith.constant 0 : index
    %c0_44 = arith.constant 0 : index
    %93 = vector.load %arg2[%c2_42, %c0_43, %c0_44] : memref<12x128x128xbf16, #tpu.memory_space<vmem>>, vector<1x128x128xbf16>
    %94 = vector.shape_cast %93 : vector<1x128x128xbf16> to vector<128x128xbf16>
    %95 = arith.truncf %92 : vector<8x128xf32> to vector<8x128xbf16>
    %cst_45 = arith.constant dense<0.000000e+00> : vector<8x128xf32>
    %96 = tpu.matmul %95, %94, %cst_45 {dimension_numbers = #tpu.dot_dimension_numbers<[1], [0], [0], [1], [0, 0, 1, 1], [], []>} : vector<8x128xbf16>, vector<128x128xbf16>, vector<8x128xf32> -> vector<8x128xf32>
    %c2_46 = arith.constant 2 : index
    %c0_47 = arith.constant 0 : index
    %c0_48 = arith.constant 0 : index
    %97 = vector.load %arg3[%c2_46, %c0_47, %c0_48] : memref<12x8x128xf32, #tpu.memory_space<vmem>>, vector<1x1x128xf32>
    %98 = vector.shape_cast %97 : vector<1x1x128xf32> to vector<1x128xf32>
    %99 = vector.broadcast %98 : vector<1x128xf32> to vector<8x128xf32>
    %100 = arith.addf %96, %99 : vector<8x128xf32>
    %c64_i32_49 = arith.constant 64 : i32
    %101 = vector.broadcast %c64_i32_49 : i32 to vector<1x128xi32>
    %102 = arith.cmpi slt, %0, %101 : vector<1x128xi32>
    %cst_50 = arith.constant 0.000000e+00 : f32
    %103 = vector.shape_cast %102 : vector<1x128xi1> to vector<1x128xi1>
    %104 = vector.broadcast %103 : vector<1x128xi1> to vector<8x128xi1>
    %105 = vector.broadcast %cst_50 : f32 to vector<8x128xf32>
    %106 = arith.select %104, %100, %105 : vector<8x128xi1>, vector<8x128xf32>
    %cst_51 = arith.constant dense<0.000000e+00> : vector<8xf32>
    %107 = vector.multi_reduction <add>, %106, %cst_51 [1] : vector<8x128xf32> to vector<8xf32>
    %108 = vector.shape_cast %107 : vector<8xf32> to vector<8x1xf32>
    %cst_52 = arith.constant 1.562500e-02 : f32
    %109 = vector.broadcast %cst_52 : f32 to vector<8x1xf32>
    %110 = arith.mulf %108, %109 : vector<8x1xf32>
    %111 = vector.broadcast %110 : vector<8x1xf32> to vector<8x128xf32>
    %112 = arith.subf %100, %111 : vector<8x128xf32>
    %cst_53 = arith.constant 0.000000e+00 : f32
    %113 = vector.shape_cast %102 : vector<1x128xi1> to vector<1x128xi1>
    %114 = vector.broadcast %113 : vector<1x128xi1> to vector<8x128xi1>
    %115 = vector.broadcast %cst_53 : f32 to vector<8x128xf32>
    %116 = arith.select %114, %112, %115 : vector<8x128xi1>, vector<8x128xf32>
    %117 = arith.mulf %116, %116 : vector<8x128xf32>
    %cst_54 = arith.constant dense<0.000000e+00> : vector<8xf32>
    %118 = vector.multi_reduction <add>, %117, %cst_54 [1] : vector<8x128xf32> to vector<8xf32>
    %119 = vector.shape_cast %118 : vector<8xf32> to vector<8x1xf32>
    %cst_55 = arith.constant 1.562500e-02 : f32
    %120 = vector.broadcast %cst_55 : f32 to vector<8x1xf32>
    %121 = arith.mulf %119, %120 : vector<8x1xf32>
    %cst_56 = arith.constant 9.99999974E-6 : f32
    %122 = vector.broadcast %cst_56 : f32 to vector<8x1xf32>
    %123 = arith.addf %121, %122 : vector<8x1xf32>
    %124 = math.rsqrt %123 : vector<8x1xf32>
    %125 = vector.broadcast %124 : vector<8x1xf32> to vector<8x128xf32>
    %126 = arith.mulf %116, %125 : vector<8x128xf32>
    %c2_57 = arith.constant 2 : index
    %c1_58 = arith.constant 1 : index
    %c0_59 = arith.constant 0 : index
    %127 = vector.load %arg3[%c2_57, %c1_58, %c0_59] : memref<12x8x128xf32, #tpu.memory_space<vmem>>, vector<1x1x128xf32>
    %128 = vector.shape_cast %127 : vector<1x1x128xf32> to vector<1x128xf32>
    %129 = vector.broadcast %128 : vector<1x128xf32> to vector<8x128xf32>
    %130 = arith.mulf %126, %129 : vector<8x128xf32>
    %c2_60 = arith.constant 2 : index
    %c2_61 = arith.constant 2 : index
    %c0_62 = arith.constant 0 : index
    %131 = vector.load %arg3[%c2_60, %c2_61, %c0_62] : memref<12x8x128xf32, #tpu.memory_space<vmem>>, vector<1x1x128xf32>
    %132 = vector.shape_cast %131 : vector<1x1x128xf32> to vector<1x128xf32>
    %133 = vector.broadcast %132 : vector<1x128xf32> to vector<8x128xf32>
    %134 = arith.addf %130, %133 : vector<8x128xf32>
    %cst_63 = arith.constant 5.000000e-01 : f32
    %135 = vector.broadcast %cst_63 : f32 to vector<8x128xf32>
    %136 = arith.mulf %135, %134 : vector<8x128xf32>
    %cst_64 = arith.constant 0.707106769 : f32
    %137 = vector.broadcast %cst_64 : f32 to vector<8x128xf32>
    %138 = arith.mulf %134, %137 : vector<8x128xf32>
    %139 = math.erf %138 : vector<8x128xf32>
    %cst_65 = arith.constant 1.000000e+00 : f32
    %140 = vector.broadcast %cst_65 : f32 to vector<8x128xf32>
    %141 = arith.addf %140, %139 : vector<8x128xf32>
    %142 = arith.mulf %136, %141 : vector<8x128xf32>
    %c3 = arith.constant 3 : index
    %c0_66 = arith.constant 0 : index
    %c0_67 = arith.constant 0 : index
    %143 = vector.load %arg2[%c3, %c0_66, %c0_67] : memref<12x128x128xbf16, #tpu.memory_space<vmem>>, vector<1x128x128xbf16>
    %144 = vector.shape_cast %143 : vector<1x128x128xbf16> to vector<128x128xbf16>
    %145 = arith.truncf %142 : vector<8x128xf32> to vector<8x128xbf16>
    %cst_68 = arith.constant dense<0.000000e+00> : vector<8x128xf32>
    %146 = tpu.matmul %145, %144, %cst_68 {dimension_numbers = #tpu.dot_dimension_numbers<[1], [0], [0], [1], [0, 0, 1, 1], [], []>} : vector<8x128xbf16>, vector<128x128xbf16>, vector<8x128xf32> -> vector<8x128xf32>
    %c3_69 = arith.constant 3 : index
    %c0_70 = arith.constant 0 : index
    %c0_71 = arith.constant 0 : index
    %147 = vector.load %arg3[%c3_69, %c0_70, %c0_71] : memref<12x8x128xf32, #tpu.memory_space<vmem>>, vector<1x1x128xf32>
    %148 = vector.shape_cast %147 : vector<1x1x128xf32> to vector<1x128xf32>
    %149 = vector.broadcast %148 : vector<1x128xf32> to vector<8x128xf32>
    %150 = arith.addf %146, %149 : vector<8x128xf32>
    %c64_i32_72 = arith.constant 64 : i32
    %151 = vector.broadcast %c64_i32_72 : i32 to vector<1x128xi32>
    %152 = arith.cmpi slt, %0, %151 : vector<1x128xi32>
    %cst_73 = arith.constant 0.000000e+00 : f32
    %153 = vector.shape_cast %152 : vector<1x128xi1> to vector<1x128xi1>
    %154 = vector.broadcast %153 : vector<1x128xi1> to vector<8x128xi1>
    %155 = vector.broadcast %cst_73 : f32 to vector<8x128xf32>
    %156 = arith.select %154, %150, %155 : vector<8x128xi1>, vector<8x128xf32>
    %cst_74 = arith.constant dense<0.000000e+00> : vector<8xf32>
    %157 = vector.multi_reduction <add>, %156, %cst_74 [1] : vector<8x128xf32> to vector<8xf32>
    %158 = vector.shape_cast %157 : vector<8xf32> to vector<8x1xf32>
    %cst_75 = arith.constant 1.562500e-02 : f32
    %159 = vector.broadcast %cst_75 : f32 to vector<8x1xf32>
    %160 = arith.mulf %158, %159 : vector<8x1xf32>
    %161 = vector.broadcast %160 : vector<8x1xf32> to vector<8x128xf32>
    %162 = arith.subf %150, %161 : vector<8x128xf32>
    %cst_76 = arith.constant 0.000000e+00 : f32
    %163 = vector.shape_cast %152 : vector<1x128xi1> to vector<1x128xi1>
    %164 = vector.broadcast %163 : vector<1x128xi1> to vector<8x128xi1>
    %165 = vector.broadcast %cst_76 : f32 to vector<8x128xf32>
    %166 = arith.select %164, %162, %165 : vector<8x128xi1>, vector<8x128xf32>
    %167 = arith.mulf %166, %166 : vector<8x128xf32>
    %cst_77 = arith.constant dense<0.000000e+00> : vector<8xf32>
    %168 = vector.multi_reduction <add>, %167, %cst_77 [1] : vector<8x128xf32> to vector<8xf32>
    %169 = vector.shape_cast %168 : vector<8xf32> to vector<8x1xf32>
    %cst_78 = arith.constant 1.562500e-02 : f32
    %170 = vector.broadcast %cst_78 : f32 to vector<8x1xf32>
    %171 = arith.mulf %169, %170 : vector<8x1xf32>
    %cst_79 = arith.constant 9.99999974E-6 : f32
    %172 = vector.broadcast %cst_79 : f32 to vector<8x1xf32>
    %173 = arith.addf %171, %172 : vector<8x1xf32>
    %174 = math.rsqrt %173 : vector<8x1xf32>
    %175 = vector.broadcast %174 : vector<8x1xf32> to vector<8x128xf32>
    %176 = arith.mulf %166, %175 : vector<8x128xf32>
    %c3_80 = arith.constant 3 : index
    %c1_81 = arith.constant 1 : index
    %c0_82 = arith.constant 0 : index
    %177 = vector.load %arg3[%c3_80, %c1_81, %c0_82] : memref<12x8x128xf32, #tpu.memory_space<vmem>>, vector<1x1x128xf32>
    %178 = vector.shape_cast %177 : vector<1x1x128xf32> to vector<1x128xf32>
    %179 = vector.broadcast %178 : vector<1x128xf32> to vector<8x128xf32>
    %180 = arith.mulf %176, %179 : vector<8x128xf32>
    %c3_83 = arith.constant 3 : index
    %c2_84 = arith.constant 2 : index
    %c0_85 = arith.constant 0 : index
    %181 = vector.load %arg3[%c3_83, %c2_84, %c0_85] : memref<12x8x128xf32, #tpu.memory_space<vmem>>, vector<1x1x128xf32>
    %182 = vector.shape_cast %181 : vector<1x1x128xf32> to vector<1x128xf32>
    %183 = vector.broadcast %182 : vector<1x128xf32> to vector<8x128xf32>
    %184 = arith.addf %180, %183 : vector<8x128xf32>
    %185 = arith.addf %184, %92 : vector<8x128xf32>
    %c4 = arith.constant 4 : index
    %c0_86 = arith.constant 0 : index
    %c0_87 = arith.constant 0 : index
    %186 = vector.load %arg2[%c4, %c0_86, %c0_87] : memref<12x128x128xbf16, #tpu.memory_space<vmem>>, vector<1x128x128xbf16>
    %187 = vector.shape_cast %186 : vector<1x128x128xbf16> to vector<128x128xbf16>
    %188 = arith.truncf %185 : vector<8x128xf32> to vector<8x128xbf16>
    %cst_88 = arith.constant dense<0.000000e+00> : vector<8x128xf32>
    %189 = tpu.matmul %188, %187, %cst_88 {dimension_numbers = #tpu.dot_dimension_numbers<[1], [0], [0], [1], [0, 0, 1, 1], [], []>} : vector<8x128xbf16>, vector<128x128xbf16>, vector<8x128xf32> -> vector<8x128xf32>
    %c4_89 = arith.constant 4 : index
    %c0_90 = arith.constant 0 : index
    %c0_91 = arith.constant 0 : index
    %190 = vector.load %arg3[%c4_89, %c0_90, %c0_91] : memref<12x8x128xf32, #tpu.memory_space<vmem>>, vector<1x1x128xf32>
    %191 = vector.shape_cast %190 : vector<1x1x128xf32> to vector<1x128xf32>
    %192 = vector.broadcast %191 : vector<1x128xf32> to vector<8x128xf32>
    %193 = arith.addf %189, %192 : vector<8x128xf32>
    %c64_i32_92 = arith.constant 64 : i32
    %194 = vector.broadcast %c64_i32_92 : i32 to vector<1x128xi32>
    %195 = arith.cmpi slt, %0, %194 : vector<1x128xi32>
    %cst_93 = arith.constant 0.000000e+00 : f32
    %196 = vector.shape_cast %195 : vector<1x128xi1> to vector<1x128xi1>
    %197 = vector.broadcast %196 : vector<1x128xi1> to vector<8x128xi1>
    %198 = vector.broadcast %cst_93 : f32 to vector<8x128xf32>
    %199 = arith.select %197, %193, %198 : vector<8x128xi1>, vector<8x128xf32>
    %cst_94 = arith.constant dense<0.000000e+00> : vector<8xf32>
    %200 = vector.multi_reduction <add>, %199, %cst_94 [1] : vector<8x128xf32> to vector<8xf32>
    %201 = vector.shape_cast %200 : vector<8xf32> to vector<8x1xf32>
    %cst_95 = arith.constant 1.562500e-02 : f32
    %202 = vector.broadcast %cst_95 : f32 to vector<8x1xf32>
    %203 = arith.mulf %201, %202 : vector<8x1xf32>
    %204 = vector.broadcast %203 : vector<8x1xf32> to vector<8x128xf32>
    %205 = arith.subf %193, %204 : vector<8x128xf32>
    %cst_96 = arith.constant 0.000000e+00 : f32
    %206 = vector.shape_cast %195 : vector<1x128xi1> to vector<1x128xi1>
    %207 = vector.broadcast %206 : vector<1x128xi1> to vector<8x128xi1>
    %208 = vector.broadcast %cst_96 : f32 to vector<8x128xf32>
    %209 = arith.select %207, %205, %208 : vector<8x128xi1>, vector<8x128xf32>
    %210 = arith.mulf %209, %209 : vector<8x128xf32>
    %cst_97 = arith.constant dense<0.000000e+00> : vector<8xf32>
    %211 = vector.multi_reduction <add>, %210, %cst_97 [1] : vector<8x128xf32> to vector<8xf32>
    %212 = vector.shape_cast %211 : vector<8xf32> to vector<8x1xf32>
    %cst_98 = arith.constant 1.562500e-02 : f32
    %213 = vector.broadcast %cst_98 : f32 to vector<8x1xf32>
    %214 = arith.mulf %212, %213 : vector<8x1xf32>
    %cst_99 = arith.constant 9.99999974E-6 : f32
    %215 = vector.broadcast %cst_99 : f32 to vector<8x1xf32>
    %216 = arith.addf %214, %215 : vector<8x1xf32>
    %217 = math.rsqrt %216 : vector<8x1xf32>
    %218 = vector.broadcast %217 : vector<8x1xf32> to vector<8x128xf32>
    %219 = arith.mulf %209, %218 : vector<8x128xf32>
    %c5 = arith.constant 5 : index
    %c0_100 = arith.constant 0 : index
    %c0_101 = arith.constant 0 : index
    %220 = vector.load %arg2[%c5, %c0_100, %c0_101] : memref<12x128x128xbf16, #tpu.memory_space<vmem>>, vector<1x128x128xbf16>
    %221 = vector.shape_cast %220 : vector<1x128x128xbf16> to vector<128x128xbf16>
    %222 = arith.truncf %219 : vector<8x128xf32> to vector<8x128xbf16>
    %cst_102 = arith.constant dense<0.000000e+00> : vector<8x128xf32>
    %223 = tpu.matmul %222, %221, %cst_102 {dimension_numbers = #tpu.dot_dimension_numbers<[1], [0], [0], [1], [0, 0, 1, 1], [], []>} : vector<8x128xbf16>, vector<128x128xbf16>, vector<8x128xf32> -> vector<8x128xf32>
    %c5_103 = arith.constant 5 : index
    %c0_104 = arith.constant 0 : index
    %c0_105 = arith.constant 0 : index
    %224 = vector.load %arg3[%c5_103, %c0_104, %c0_105] : memref<12x8x128xf32, #tpu.memory_space<vmem>>, vector<1x1x128xf32>
    %225 = vector.shape_cast %224 : vector<1x1x128xf32> to vector<1x128xf32>
    %226 = vector.broadcast %225 : vector<1x128xf32> to vector<8x128xf32>
    %227 = arith.addf %223, %226 : vector<8x128xf32>
    %c32_i32 = arith.constant 32 : i32
    %228 = vector.broadcast %c32_i32 : i32 to vector<1x128xi32>
    %229 = arith.cmpi slt, %0, %228 : vector<1x128xi32>
    %cst_106 = arith.constant 0.000000e+00 : f32
    %230 = vector.shape_cast %229 : vector<1x128xi1> to vector<1x128xi1>
    %231 = vector.broadcast %230 : vector<1x128xi1> to vector<8x128xi1>
    %232 = vector.broadcast %cst_106 : f32 to vector<8x128xf32>
    %233 = arith.select %231, %227, %232 : vector<8x128xi1>, vector<8x128xf32>
    %cst_107 = arith.constant dense<0.000000e+00> : vector<8xf32>
    %234 = vector.multi_reduction <add>, %233, %cst_107 [1] : vector<8x128xf32> to vector<8xf32>
    %235 = vector.shape_cast %234 : vector<8xf32> to vector<8x1xf32>
    %cst_108 = arith.constant 3.125000e-02 : f32
    %236 = vector.broadcast %cst_108 : f32 to vector<8x1xf32>
    %237 = arith.mulf %235, %236 : vector<8x1xf32>
    %238 = vector.broadcast %237 : vector<8x1xf32> to vector<8x128xf32>
    %239 = arith.subf %227, %238 : vector<8x128xf32>
    %cst_109 = arith.constant 0.000000e+00 : f32
    %240 = vector.shape_cast %229 : vector<1x128xi1> to vector<1x128xi1>
    %241 = vector.broadcast %240 : vector<1x128xi1> to vector<8x128xi1>
    %242 = vector.broadcast %cst_109 : f32 to vector<8x128xf32>
    %243 = arith.select %241, %239, %242 : vector<8x128xi1>, vector<8x128xf32>
    %244 = arith.mulf %243, %243 : vector<8x128xf32>
    %cst_110 = arith.constant dense<0.000000e+00> : vector<8xf32>
    %245 = vector.multi_reduction <add>, %244, %cst_110 [1] : vector<8x128xf32> to vector<8xf32>
    %246 = vector.shape_cast %245 : vector<8xf32> to vector<8x1xf32>
    %cst_111 = arith.constant 3.125000e-02 : f32
    %247 = vector.broadcast %cst_111 : f32 to vector<8x1xf32>
    %248 = arith.mulf %246, %247 : vector<8x1xf32>
    %cst_112 = arith.constant 9.99999974E-6 : f32
    %249 = vector.broadcast %cst_112 : f32 to vector<8x1xf32>
    %250 = arith.addf %248, %249 : vector<8x1xf32>
    %251 = math.rsqrt %250 : vector<8x1xf32>
    %252 = vector.broadcast %251 : vector<8x1xf32> to vector<8x128xf32>
    %253 = arith.mulf %243, %252 : vector<8x128xf32>
    %c5_113 = arith.constant 5 : index
    %c1_114 = arith.constant 1 : index
    %c0_115 = arith.constant 0 : index
    %254 = vector.load %arg3[%c5_113, %c1_114, %c0_115] : memref<12x8x128xf32, #tpu.memory_space<vmem>>, vector<1x1x128xf32>
    %255 = vector.shape_cast %254 : vector<1x1x128xf32> to vector<1x128xf32>
    %256 = vector.broadcast %255 : vector<1x128xf32> to vector<8x128xf32>
    %257 = arith.mulf %253, %256 : vector<8x128xf32>
    %c5_116 = arith.constant 5 : index
    %c2_117 = arith.constant 2 : index
    %c0_118 = arith.constant 0 : index
    %258 = vector.load %arg3[%c5_116, %c2_117, %c0_118] : memref<12x8x128xf32, #tpu.memory_space<vmem>>, vector<1x1x128xf32>
    %259 = vector.shape_cast %258 : vector<1x1x128xf32> to vector<1x128xf32>
    %260 = vector.broadcast %259 : vector<1x128xf32> to vector<8x128xf32>
    %261 = arith.addf %257, %260 : vector<8x128xf32>
    %262 = math.tanh %261 : vector<8x128xf32>
    %263 = vector.extract_strided_slice %262 {offsets = [0, 0], sizes = [8, 32], strides = [1, 1]} : vector<8x128xf32> to vector<8x32xf32>
    %c0_119 = arith.constant 0 : index
    %c0_120 = arith.constant 0 : index
    %264 = vector.load %arg4[%c0_119, %c0_120] : memref<8x32xf32, #tpu.memory_space<vmem>>, vector<8x32xf32>
    tpu.vector_store %arg4[%c0_119, %c0_120], %263 {strides = array<i32>} : memref<8x32xf32, #tpu.memory_space<vmem>>, vector<8x32xf32>,
    %c6 = arith.constant 6 : index
    %c0_121 = arith.constant 0 : index
    %c0_122 = arith.constant 0 : index
    %265 = vector.load %arg2[%c6, %c0_121, %c0_122] : memref<12x128x128xbf16, #tpu.memory_space<vmem>>, vector<1x128x128xbf16>
    %266 = vector.shape_cast %265 : vector<1x128x128xbf16> to vector<128x128xbf16>
    %267 = arith.truncf %262 : vector<8x128xf32> to vector<8x128xbf16>
    %cst_123 = arith.constant dense<0.000000e+00> : vector<8x128xf32>
    %268 = tpu.matmul %267, %266, %cst_123 {dimension_numbers = #tpu.dot_dimension_numbers<[1], [0], [0], [1], [0, 0, 1, 1], [], []>} : vector<8x128xbf16>, vector<128x128xbf16>, vector<8x128xf32> -> vector<8x128xf32>
    %c6_124 = arith.constant 6 : index
    %c0_125 = arith.constant 0 : index
    %c0_126 = arith.constant 0 : index
    %269 = vector.load %arg3[%c6_124, %c0_125, %c0_126] : memref<12x8x128xf32, #tpu.memory_space<vmem>>, vector<1x1x128xf32>
    %270 = vector.shape_cast %269 : vector<1x1x128xf32> to vector<1x128xf32>
    %271 = vector.broadcast %270 : vector<1x128xf32> to vector<8x128xf32>
    %272 = arith.addf %268, %271 : vector<8x128xf32>
    %c64_i32_127 = arith.constant 64 : i32
    %273 = vector.broadcast %c64_i32_127 : i32 to vector<1x128xi32>
    %274 = arith.cmpi slt, %0, %273 : vector<1x128xi32>
    %cst_128 = arith.constant 0.000000e+00 : f32
    %275 = vector.shape_cast %274 : vector<1x128xi1> to vector<1x128xi1>
    %276 = vector.broadcast %275 : vector<1x128xi1> to vector<8x128xi1>
    %277 = vector.broadcast %cst_128 : f32 to vector<8x128xf32>
    %278 = arith.select %276, %272, %277 : vector<8x128xi1>, vector<8x128xf32>
    %cst_129 = arith.constant dense<0.000000e+00> : vector<8xf32>
    %279 = vector.multi_reduction <add>, %278, %cst_129 [1] : vector<8x128xf32> to vector<8xf32>
    %280 = vector.shape_cast %279 : vector<8xf32> to vector<8x1xf32>
    %cst_130 = arith.constant 1.562500e-02 : f32
    %281 = vector.broadcast %cst_130 : f32 to vector<8x1xf32>
    %282 = arith.mulf %280, %281 : vector<8x1xf32>
    %283 = vector.broadcast %282 : vector<8x1xf32> to vector<8x128xf32>
    %284 = arith.subf %272, %283 : vector<8x128xf32>
    %cst_131 = arith.constant 0.000000e+00 : f32
    %285 = vector.shape_cast %274 : vector<1x128xi1> to vector<1x128xi1>
    %286 = vector.broadcast %285 : vector<1x128xi1> to vector<8x128xi1>
    %287 = vector.broadcast %cst_131 : f32 to vector<8x128xf32>
    %288 = arith.select %286, %284, %287 : vector<8x128xi1>, vector<8x128xf32>
    %289 = arith.mulf %288, %288 : vector<8x128xf32>
    %cst_132 = arith.constant dense<0.000000e+00> : vector<8xf32>
    %290 = vector.multi_reduction <add>, %289, %cst_132 [1] : vector<8x128xf32> to vector<8xf32>
    %291 = vector.shape_cast %290 : vector<8xf32> to vector<8x1xf32>
    %cst_133 = arith.constant 1.562500e-02 : f32
    %292 = vector.broadcast %cst_133 : f32 to vector<8x1xf32>
    %293 = arith.mulf %291, %292 : vector<8x1xf32>
    %cst_134 = arith.constant 9.99999974E-6 : f32
    %294 = vector.broadcast %cst_134 : f32 to vector<8x1xf32>
    %295 = arith.addf %293, %294 : vector<8x1xf32>
    %296 = math.rsqrt %295 : vector<8x1xf32>
    %297 = vector.broadcast %296 : vector<8x1xf32> to vector<8x128xf32>
    %298 = arith.mulf %288, %297 : vector<8x128xf32>
    %c6_135 = arith.constant 6 : index
    %c1_136 = arith.constant 1 : index
    %c0_137 = arith.constant 0 : index
    %299 = vector.load %arg3[%c6_135, %c1_136, %c0_137] : memref<12x8x128xf32, #tpu.memory_space<vmem>>, vector<1x1x128xf32>
    %300 = vector.shape_cast %299 : vector<1x1x128xf32> to vector<1x128xf32>
    %301 = vector.broadcast %300 : vector<1x128xf32> to vector<8x128xf32>
    %302 = arith.mulf %298, %301 : vector<8x128xf32>
    %c6_138 = arith.constant 6 : index
    %c2_139 = arith.constant 2 : index
    %c0_140 = arith.constant 0 : index
    %303 = vector.load %arg3[%c6_138, %c2_139, %c0_140] : memref<12x8x128xf32, #tpu.memory_space<vmem>>, vector<1x1x128xf32>
    %304 = vector.shape_cast %303 : vector<1x1x128xf32> to vector<1x128xf32>
    %305 = vector.broadcast %304 : vector<1x128xf32> to vector<8x128xf32>
    %306 = arith.addf %302, %305 : vector<8x128xf32>
    %cst_141 = arith.constant 5.000000e-01 : f32
    %307 = vector.broadcast %cst_141 : f32 to vector<8x128xf32>
    %308 = arith.mulf %307, %306 : vector<8x128xf32>
    %cst_142 = arith.constant 0.707106769 : f32
    %309 = vector.broadcast %cst_142 : f32 to vector<8x128xf32>
    %310 = arith.mulf %306, %309 : vector<8x128xf32>
    %311 = math.erf %310 : vector<8x128xf32>
    %cst_143 = arith.constant 1.000000e+00 : f32
    %312 = vector.broadcast %cst_143 : f32 to vector<8x128xf32>
    %313 = arith.addf %312, %311 : vector<8x128xf32>
    %314 = arith.mulf %308, %313 : vector<8x128xf32>
    %c7 = arith.constant 7 : index
    %c0_144 = arith.constant 0 : index
    %c0_145 = arith.constant 0 : index
    %315 = vector.load %arg2[%c7, %c0_144, %c0_145] : memref<12x128x128xbf16, #tpu.memory_space<vmem>>, vector<1x128x128xbf16>
    %316 = vector.shape_cast %315 : vector<1x128x128xbf16> to vector<128x128xbf16>
    %317 = arith.truncf %314 : vector<8x128xf32> to vector<8x128xbf16>
    %cst_146 = arith.constant dense<0.000000e+00> : vector<8x128xf32>
    %318 = tpu.matmul %317, %316, %cst_146 {dimension_numbers = #tpu.dot_dimension_numbers<[1], [0], [0], [1], [0, 0, 1, 1], [], []>} : vector<8x128xbf16>, vector<128x128xbf16>, vector<8x128xf32> -> vector<8x128xf32>
    %c7_147 = arith.constant 7 : index
    %c0_148 = arith.constant 0 : index
    %c0_149 = arith.constant 0 : index
    %319 = vector.load %arg3[%c7_147, %c0_148, %c0_149] : memref<12x8x128xf32, #tpu.memory_space<vmem>>, vector<1x1x128xf32>
    %320 = vector.shape_cast %319 : vector<1x1x128xf32> to vector<1x128xf32>
    %321 = vector.broadcast %320 : vector<1x128xf32> to vector<8x128xf32>
    %322 = arith.addf %318, %321 : vector<8x128xf32>
    %c64_i32_150 = arith.constant 64 : i32
    %323 = vector.broadcast %c64_i32_150 : i32 to vector<1x128xi32>
    %324 = arith.cmpi slt, %0, %323 : vector<1x128xi32>
    %cst_151 = arith.constant 0.000000e+00 : f32
    %325 = vector.shape_cast %324 : vector<1x128xi1> to vector<1x128xi1>
    %326 = vector.broadcast %325 : vector<1x128xi1> to vector<8x128xi1>
    %327 = vector.broadcast %cst_151 : f32 to vector<8x128xf32>
    %328 = arith.select %326, %322, %327 : vector<8x128xi1>, vector<8x128xf32>
    %cst_152 = arith.constant dense<0.000000e+00> : vector<8xf32>
    %329 = vector.multi_reduction <add>, %328, %cst_152 [1] : vector<8x128xf32> to vector<8xf32>
    %330 = vector.shape_cast %329 : vector<8xf32> to vector<8x1xf32>
    %cst_153 = arith.constant 1.562500e-02 : f32
    %331 = vector.broadcast %cst_153 : f32 to vector<8x1xf32>
    %332 = arith.mulf %330, %331 : vector<8x1xf32>
    %333 = vector.broadcast %332 : vector<8x1xf32> to vector<8x128xf32>
    %334 = arith.subf %322, %333 : vector<8x128xf32>
    %cst_154 = arith.constant 0.000000e+00 : f32
    %335 = vector.shape_cast %324 : vector<1x128xi1> to vector<1x128xi1>
    %336 = vector.broadcast %335 : vector<1x128xi1> to vector<8x128xi1>
    %337 = vector.broadcast %cst_154 : f32 to vector<8x128xf32>
    %338 = arith.select %336, %334, %337 : vector<8x128xi1>, vector<8x128xf32>
    %339 = arith.mulf %338, %338 : vector<8x128xf32>
    %cst_155 = arith.constant dense<0.000000e+00> : vector<8xf32>
    %340 = vector.multi_reduction <add>, %339, %cst_155 [1] : vector<8x128xf32> to vector<8xf32>
    %341 = vector.shape_cast %340 : vector<8xf32> to vector<8x1xf32>
    %cst_156 = arith.constant 1.562500e-02 : f32
    %342 = vector.broadcast %cst_156 : f32 to vector<8x1xf32>
    %343 = arith.mulf %341, %342 : vector<8x1xf32>
    %cst_157 = arith.constant 9.99999974E-6 : f32
    %344 = vector.broadcast %cst_157 : f32 to vector<8x1xf32>
    %345 = arith.addf %343, %344 : vector<8x1xf32>
    %346 = math.rsqrt %345 : vector<8x1xf32>
    %347 = vector.broadcast %346 : vector<8x1xf32> to vector<8x128xf32>
    %348 = arith.mulf %338, %347 : vector<8x128xf32>
    %c7_158 = arith.constant 7 : index
    %c1_159 = arith.constant 1 : index
    %c0_160 = arith.constant 0 : index
    %349 = vector.load %arg3[%c7_158, %c1_159, %c0_160] : memref<12x8x128xf32, #tpu.memory_space<vmem>>, vector<1x1x128xf32>
    %350 = vector.shape_cast %349 : vector<1x1x128xf32> to vector<1x128xf32>
    %351 = vector.broadcast %350 : vector<1x128xf32> to vector<8x128xf32>
    %352 = arith.mulf %348, %351 : vector<8x128xf32>
    %c7_161 = arith.constant 7 : index
    %c2_162 = arith.constant 2 : index
    %c0_163 = arith.constant 0 : index
    %353 = vector.load %arg3[%c7_161, %c2_162, %c0_163] : memref<12x8x128xf32, #tpu.memory_space<vmem>>, vector<1x1x128xf32>
    %354 = vector.shape_cast %353 : vector<1x1x128xf32> to vector<1x128xf32>
    %355 = vector.broadcast %354 : vector<1x128xf32> to vector<8x128xf32>
    %356 = arith.addf %352, %355 : vector<8x128xf32>
    %cst_164 = arith.constant 5.000000e-01 : f32
    %357 = vector.broadcast %cst_164 : f32 to vector<8x128xf32>
    %358 = arith.mulf %357, %356 : vector<8x128xf32>
    %cst_165 = arith.constant 0.707106769 : f32
    %359 = vector.broadcast %cst_165 : f32 to vector<8x128xf32>
    %360 = arith.mulf %356, %359 : vector<8x128xf32>
    %361 = math.erf %360 : vector<8x128xf32>
    %cst_166 = arith.constant 1.000000e+00 : f32
    %362 = vector.broadcast %cst_166 : f32 to vector<8x128xf32>
    %363 = arith.addf %362, %361 : vector<8x128xf32>
    %364 = arith.mulf %358, %363 : vector<8x128xf32>
    %c8 = arith.constant 8 : index
    %c0_167 = arith.constant 0 : index
    %c0_168 = arith.constant 0 : index
    %365 = vector.load %arg2[%c8, %c0_167, %c0_168] : memref<12x128x128xbf16, #tpu.memory_space<vmem>>, vector<1x128x128xbf16>
    %366 = vector.shape_cast %365 : vector<1x128x128xbf16> to vector<128x128xbf16>
    %367 = arith.truncf %364 : vector<8x128xf32> to vector<8x128xbf16>
    %cst_169 = arith.constant dense<0.000000e+00> : vector<8x128xf32>
    %368 = tpu.matmul %367, %366, %cst_169 {dimension_numbers = #tpu.dot_dimension_numbers<[1], [0], [0], [1], [0, 0, 1, 1], [], []>} : vector<8x128xbf16>, vector<128x128xbf16>, vector<8x128xf32> -> vector<8x128xf32>
    %c8_170 = arith.constant 8 : index
    %c0_171 = arith.constant 0 : index
    %c0_172 = arith.constant 0 : index
    %369 = vector.load %arg3[%c8_170, %c0_171, %c0_172] : memref<12x8x128xf32, #tpu.memory_space<vmem>>, vector<1x1x128xf32>
    %370 = vector.shape_cast %369 : vector<1x1x128xf32> to vector<1x128xf32>
    %371 = vector.broadcast %370 : vector<1x128xf32> to vector<8x128xf32>
    %372 = arith.addf %368, %371 : vector<8x128xf32>
    %c64_i32_173 = arith.constant 64 : i32
    %373 = vector.broadcast %c64_i32_173 : i32 to vector<1x128xi32>
    %374 = arith.cmpi slt, %0, %373 : vector<1x128xi32>
    %cst_174 = arith.constant 0.000000e+00 : f32
    %375 = vector.shape_cast %374 : vector<1x128xi1> to vector<1x128xi1>
    %376 = vector.broadcast %375 : vector<1x128xi1> to vector<8x128xi1>
    %377 = vector.broadcast %cst_174 : f32 to vector<8x128xf32>
    %378 = arith.select %376, %372, %377 : vector<8x128xi1>, vector<8x128xf32>
    %cst_175 = arith.constant dense<0.000000e+00> : vector<8xf32>
    %379 = vector.multi_reduction <add>, %378, %cst_175 [1] : vector<8x128xf32> to vector<8xf32>
    %380 = vector.shape_cast %379 : vector<8xf32> to vector<8x1xf32>
    %cst_176 = arith.constant 1.562500e-02 : f32
    %381 = vector.broadcast %cst_176 : f32 to vector<8x1xf32>
    %382 = arith.mulf %380, %381 : vector<8x1xf32>
    %383 = vector.broadcast %382 : vector<8x1xf32> to vector<8x128xf32>
    %384 = arith.subf %372, %383 : vector<8x128xf32>
    %cst_177 = arith.constant 0.000000e+00 : f32
    %385 = vector.shape_cast %374 : vector<1x128xi1> to vector<1x128xi1>
    %386 = vector.broadcast %385 : vector<1x128xi1> to vector<8x128xi1>
    %387 = vector.broadcast %cst_177 : f32 to vector<8x128xf32>
    %388 = arith.select %386, %384, %387 : vector<8x128xi1>, vector<8x128xf32>
    %389 = arith.mulf %388, %388 : vector<8x128xf32>
    %cst_178 = arith.constant dense<0.000000e+00> : vector<8xf32>
    %390 = vector.multi_reduction <add>, %389, %cst_178 [1] : vector<8x128xf32> to vector<8xf32>
    %391 = vector.shape_cast %390 : vector<8xf32> to vector<8x1xf32>
    %cst_179 = arith.constant 1.562500e-02 : f32
    %392 = vector.broadcast %cst_179 : f32 to vector<8x1xf32>
    %393 = arith.mulf %391, %392 : vector<8x1xf32>
    %cst_180 = arith.constant 9.99999974E-6 : f32
    %394 = vector.broadcast %cst_180 : f32 to vector<8x1xf32>
    %395 = arith.addf %393, %394 : vector<8x1xf32>
    %396 = math.rsqrt %395 : vector<8x1xf32>
    %397 = vector.broadcast %396 : vector<8x1xf32> to vector<8x128xf32>
    %398 = arith.mulf %388, %397 : vector<8x128xf32>
    %c8_181 = arith.constant 8 : index
    %c1_182 = arith.constant 1 : index
    %c0_183 = arith.constant 0 : index
    %399 = vector.load %arg3[%c8_181, %c1_182, %c0_183] : memref<12x8x128xf32, #tpu.memory_space<vmem>>, vector<1x1x128xf32>
    %400 = vector.shape_cast %399 : vector<1x1x128xf32> to vector<1x128xf32>
    %401 = vector.broadcast %400 : vector<1x128xf32> to vector<8x128xf32>
    %402 = arith.mulf %398, %401 : vector<8x128xf32>
    %c8_184 = arith.constant 8 : index
    %c2_185 = arith.constant 2 : index
    %c0_186 = arith.constant 0 : index
    %403 = vector.load %arg3[%c8_184, %c2_185, %c0_186] : memref<12x8x128xf32, #tpu.memory_space<vmem>>, vector<1x1x128xf32>
    %404 = vector.shape_cast %403 : vector<1x1x128xf32> to vector<1x128xf32>
    %405 = vector.broadcast %404 : vector<1x128xf32> to vector<8x128xf32>
    %406 = arith.addf %402, %405 : vector<8x128xf32>
    %407 = arith.addf %406, %314 : vector<8x128xf32>
    %c9 = arith.constant 9 : index
    %c0_187 = arith.constant 0 : index
    %c0_188 = arith.constant 0 : index
    %408 = vector.load %arg2[%c9, %c0_187, %c0_188] : memref<12x128x128xbf16, #tpu.memory_space<vmem>>, vector<1x128x128xbf16>
    %409 = vector.shape_cast %408 : vector<1x128x128xbf16> to vector<128x128xbf16>
    %410 = arith.truncf %407 : vector<8x128xf32> to vector<8x128xbf16>
    %cst_189 = arith.constant dense<0.000000e+00> : vector<8x128xf32>
    %411 = tpu.matmul %410, %409, %cst_189 {dimension_numbers = #tpu.dot_dimension_numbers<[1], [0], [0], [1], [0, 0, 1, 1], [], []>} : vector<8x128xbf16>, vector<128x128xbf16>, vector<8x128xf32> -> vector<8x128xf32>
    %c9_190 = arith.constant 9 : index
    %c0_191 = arith.constant 0 : index
    %c0_192 = arith.constant 0 : index
    %412 = vector.load %arg3[%c9_190, %c0_191, %c0_192] : memref<12x8x128xf32, #tpu.memory_space<vmem>>, vector<1x1x128xf32>
    %413 = vector.shape_cast %412 : vector<1x1x128xf32> to vector<1x128xf32>
    %414 = vector.broadcast %413 : vector<1x128xf32> to vector<8x128xf32>
    %415 = arith.addf %411, %414 : vector<8x128xf32>
    %c64_i32_193 = arith.constant 64 : i32
    %416 = vector.broadcast %c64_i32_193 : i32 to vector<1x128xi32>
    %417 = arith.cmpi slt, %0, %416 : vector<1x128xi32>
    %cst_194 = arith.constant 0.000000e+00 : f32
    %418 = vector.shape_cast %417 : vector<1x128xi1> to vector<1x128xi1>
    %419 = vector.broadcast %418 : vector<1x128xi1> to vector<8x128xi1>
    %420 = vector.broadcast %cst_194 : f32 to vector<8x128xf32>
    %421 = arith.select %419, %415, %420 : vector<8x128xi1>, vector<8x128xf32>
    %cst_195 = arith.constant dense<0.000000e+00> : vector<8xf32>
    %422 = vector.multi_reduction <add>, %421, %cst_195 [1] : vector<8x128xf32> to vector<8xf32>
    %423 = vector.shape_cast %422 : vector<8xf32> to vector<8x1xf32>
    %cst_196 = arith.constant 1.562500e-02 : f32
    %424 = vector.broadcast %cst_196 : f32 to vector<8x1xf32>
    %425 = arith.mulf %423, %424 : vector<8x1xf32>
    %426 = vector.broadcast %425 : vector<8x1xf32> to vector<8x128xf32>
    %427 = arith.subf %415, %426 : vector<8x128xf32>
    %cst_197 = arith.constant 0.000000e+00 : f32
    %428 = vector.shape_cast %417 : vector<1x128xi1> to vector<1x128xi1>
    %429 = vector.broadcast %428 : vector<1x128xi1> to vector<8x128xi1>
    %430 = vector.broadcast %cst_197 : f32 to vector<8x128xf32>
    %431 = arith.select %429, %427, %430 : vector<8x128xi1>, vector<8x128xf32>
    %432 = arith.mulf %431, %431 : vector<8x128xf32>
    %cst_198 = arith.constant dense<0.000000e+00> : vector<8xf32>
    %433 = vector.multi_reduction <add>, %432, %cst_198 [1] : vector<8x128xf32> to vector<8xf32>
    %434 = vector.shape_cast %433 : vector<8xf32> to vector<8x1xf32>
    %cst_199 = arith.constant 1.562500e-02 : f32
    %435 = vector.broadcast %cst_199 : f32 to vector<8x1xf32>
    %436 = arith.mulf %434, %435 : vector<8x1xf32>
    %cst_200 = arith.constant 9.99999974E-6 : f32
    %437 = vector.broadcast %cst_200 : f32 to vector<8x1xf32>
    %438 = arith.addf %436, %437 : vector<8x1xf32>
    %439 = math.rsqrt %438 : vector<8x1xf32>
    %440 = vector.broadcast %439 : vector<8x1xf32> to vector<8x128xf32>
    %441 = arith.mulf %431, %440 : vector<8x128xf32>
    %c10 = arith.constant 10 : index
    %c0_201 = arith.constant 0 : index
    %c0_202 = arith.constant 0 : index
    %442 = vector.load %arg2[%c10, %c0_201, %c0_202] : memref<12x128x128xbf16, #tpu.memory_space<vmem>>, vector<1x128x128xbf16>
    %443 = vector.shape_cast %442 : vector<1x128x128xbf16> to vector<128x128xbf16>
    %444 = arith.truncf %441 : vector<8x128xf32> to vector<8x128xbf16>
    %cst_203 = arith.constant dense<0.000000e+00> : vector<8x128xf32>
    %445 = tpu.matmul %444, %443, %cst_203 {dimension_numbers = #tpu.dot_dimension_numbers<[1], [0], [0], [1], [0, 0, 1, 1], [], []>} : vector<8x128xbf16>, vector<128x128xbf16>, vector<8x128xf32> -> vector<8x128xf32>
    %c10_204 = arith.constant 10 : index
    %c0_205 = arith.constant 0 : index
    %c0_206 = arith.constant 0 : index
    %446 = vector.load %arg3[%c10_204, %c0_205, %c0_206] : memref<12x8x128xf32, #tpu.memory_space<vmem>>, vector<1x1x128xf32>
    %447 = vector.shape_cast %446 : vector<1x1x128xf32> to vector<1x128xf32>
    %448 = vector.broadcast %447 : vector<1x128xf32> to vector<8x128xf32>
    %449 = arith.addf %445, %448 : vector<8x128xf32>
    %cst_207 = arith.constant dense<0.000000e+00> : vector<8xf32>
    %450 = vector.multi_reduction <add>, %449, %cst_207 [1] : vector<8x128xf32> to vector<8xf32>
    %451 = vector.shape_cast %450 : vector<8xf32> to vector<8x1xf32>
    %cst_208 = arith.constant 7.812500e-03 : f32
    %452 = vector.broadcast %cst_208 : f32 to vector<8x1xf32>
    %453 = arith.mulf %451, %452 : vector<8x1xf32>
    %454 = vector.broadcast %453 : vector<8x1xf32> to vector<8x128xf32>
    %455 = arith.subf %449, %454 : vector<8x128xf32>
    %456 = arith.mulf %455, %455 : vector<8x128xf32>
    %cst_209 = arith.constant dense<0.000000e+00> : vector<8xf32>
    %457 = vector.multi_reduction <add>, %456, %cst_209 [1] : vector<8x128xf32> to vector<8xf32>
    %458 = vector.shape_cast %457 : vector<8xf32> to vector<8x1xf32>
    %cst_210 = arith.constant 7.812500e-03 : f32
    %459 = vector.broadcast %cst_210 : f32 to vector<8x1xf32>
    %460 = arith.mulf %458, %459 : vector<8x1xf32>
    %cst_211 = arith.constant 9.99999974E-6 : f32
    %461 = vector.broadcast %cst_211 : f32 to vector<8x1xf32>
    %462 = arith.addf %460, %461 : vector<8x1xf32>
    %463 = math.rsqrt %462 : vector<8x1xf32>
    %464 = vector.broadcast %463 : vector<8x1xf32> to vector<8x128xf32>
    %465 = arith.mulf %455, %464 : vector<8x128xf32>
    %c10_212 = arith.constant 10 : index
    %c1_213 = arith.constant 1 : index
    %c0_214 = arith.constant 0 : index
    %466 = vector.load %arg3[%c10_212, %c1_213, %c0_214] : memref<12x8x128xf32, #tpu.memory_space<vmem>>, vector<1x1x128xf32>
    %467 = vector.shape_cast %466 : vector<1x1x128xf32> to vector<1x128xf32>
    %468 = vector.broadcast %467 : vector<1x128xf32> to vector<8x128xf32>
    %469 = arith.mulf %465, %468 : vector<8x128xf32>
    %c10_215 = arith.constant 10 : index
    %c2_216 = arith.constant 2 : index
    %c0_217 = arith.constant 0 : index
    %470 = vector.load %arg3[%c10_215, %c2_216, %c0_217] : memref<12x8x128xf32, #tpu.memory_space<vmem>>, vector<1x1x128xf32>
    %471 = vector.shape_cast %470 : vector<1x1x128xf32> to vector<1x128xf32>
    %472 = vector.broadcast %471 : vector<1x128xf32> to vector<8x128xf32>
    %473 = arith.addf %469, %472 : vector<8x128xf32>
    %cst_218 = arith.constant 5.000000e-01 : f32
    %474 = vector.broadcast %cst_218 : f32 to vector<8x128xf32>
    %475 = arith.mulf %474, %473 : vector<8x128xf32>
    %cst_219 = arith.constant 0.707106769 : f32
    %476 = vector.broadcast %cst_219 : f32 to vector<8x128xf32>
    %477 = arith.mulf %473, %476 : vector<8x128xf32>
    %478 = math.erf %477 : vector<8x128xf32>
    %cst_220 = arith.constant 1.000000e+00 : f32
    %479 = vector.broadcast %cst_220 : f32 to vector<8x128xf32>
    %480 = arith.addf %479, %478 : vector<8x128xf32>
    %481 = arith.mulf %475, %480 : vector<8x128xf32>
    %c11 = arith.constant 11 : index
    %c0_221 = arith.constant 0 : index
    %c0_222 = arith.constant 0 : index
    %482 = vector.load %arg2[%c11, %c0_221, %c0_222] : memref<12x128x128xbf16, #tpu.memory_space<vmem>>, vector<1x128x128xbf16>
    %483 = vector.shape_cast %482 : vector<1x128x128xbf16> to vector<128x128xbf16>
    %484 = arith.truncf %481 : vector<8x128xf32> to vector<8x128xbf16>
    %cst_223 = arith.constant dense<0.000000e+00> : vector<8x128xf32>
    %485 = tpu.matmul %484, %483, %cst_223 {dimension_numbers = #tpu.dot_dimension_numbers<[1], [0], [0], [1], [0, 0, 1, 1], [], []>} : vector<8x128xbf16>, vector<128x128xbf16>, vector<8x128xf32> -> vector<8x128xf32>
    %c11_224 = arith.constant 11 : index
    %c0_225 = arith.constant 0 : index
    %c0_226 = arith.constant 0 : index
    %486 = vector.load %arg3[%c11_224, %c0_225, %c0_226] : memref<12x8x128xf32, #tpu.memory_space<vmem>>, vector<1x1x128xf32>
    %487 = vector.shape_cast %486 : vector<1x1x128xf32> to vector<1x128xf32>
    %488 = vector.broadcast %487 : vector<1x128xf32> to vector<8x128xf32>
    %489 = arith.addf %485, %488 : vector<8x128xf32>
    %490 = arith.negf %489 : vector<8x128xf32>
    %491 = math.exp %490 : vector<8x128xf32>
    %cst_227 = arith.constant 1.000000e+00 : f32
    %492 = vector.broadcast %cst_227 : f32 to vector<8x128xf32>
    %493 = arith.addf %492, %491 : vector<8x128xf32>
    %494 = arith.divf %492, %493 : vector<8x128xf32>
    %495 = vector.extract_strided_slice %494 {offsets = [0, 0], sizes = [8, 64], strides = [1, 1]} : vector<8x128xf32> to vector<8x64xf32>
    %c0_228 = arith.constant 0 : index
    %c0_229 = arith.constant 0 : index
    %496 = vector.load %arg5[%c0_228, %c0_229] : memref<8x64xf32, #tpu.memory_space<vmem>>, vector<8x64xf32>
    tpu.vector_store %arg5[%c0_228, %c0_229], %495 {strides = array<i32>} : memref<8x64xf32, #tpu.memory_space<vmem>>, vector<8x64xf32>,
    return
  }
  func.func @transform_0(%arg0: i32) -> (i32, i32) {
    %c0_i32 = arith.constant 0 : i32
    %c0_i32_0 = arith.constant 0 : i32
    return %arg0, %c0_i32 : i32, i32
  }
  func.func @transform_1(%arg0: i32) -> (i32, i32, i32) {
    %c0_i32 = arith.constant 0 : i32
    %c0_i32_0 = arith.constant 0 : i32
    %c0_i32_1 = arith.constant 0 : i32
    %c0_i32_2 = arith.constant 0 : i32
    return %c0_i32, %c0_i32_0, %c0_i32_1 : i32, i32, i32
  }
  func.func @transform_2(%arg0: i32) -> (i32, i32, i32) {
    %c0_i32 = arith.constant 0 : i32
    %c0_i32_0 = arith.constant 0 : i32
    %c0_i32_1 = arith.constant 0 : i32
    %c0_i32_2 = arith.constant 0 : i32
    return %c0_i32, %c0_i32_0, %c0_i32_1 : i32, i32, i32
  }
  func.func @transform_3(%arg0: i32) -> (i32, i32) {
    %c0_i32 = arith.constant 0 : i32
    %c0_i32_0 = arith.constant 0 : i32
    return %arg0, %c0_i32 : i32, i32
  }
  func.func @transform_4(%arg0: i32) -> (i32, i32) {
    %c0_i32 = arith.constant 0 : i32
    %c0_i32_0 = arith.constant 0 : i32
    return %arg0, %c0_i32 : i32, i32
  }
}

</mosaic_0001>

<bundles_post_ra>
// kernel: forward.1
= control target key start
LH: loop header
LB: loop body
LE: loop exit
PB: predicated region body
PF: predicated region fallthrough
CT: control target
= control target key end

     0   :  { %10 = vsyncpa [#allocation3], 0  ;;  %s2681_s0 = inlined_call_operand.hbm [shape: f32[8,64], index: 0, kind: input, shape index: {}]   ;;  %s2682_s1 = inlined_call_operand.hbm [shape: bf16[12,128,128], index: 1, kind: input, shape index: {}]   ;;  %s2683_s2 = inlined_call_operand.hbm [shape: f32[12,8,128], index: 2, kind: input, shape index: {}]   ;;  %s2684_s3 = inlined_call_operand.hbm [shape: f32[8,32], index: 3, kind: output, shape index: {0}]   ;;  %s2685_s4 = inlined_call_operand.hbm [shape: f32[8,64], index: 4, kind: output, shape index: {1}]  }
   0x1   :  { %11 = vsyncpa [#allocation6], 0 }
   0x2   :  { %12 = vsyncpa [#allocation4], 0 }
   0x3   :  { %13 = vsyncpa [#allocation10], 0  ;;  %s2421_s15 = smov [#allocation5]   ;;  %s2303_s19 = scalar_lea.hbm %s2682_s1, 12288 }
   0x4   :  { %s29_s16 = sshll.u32 %s2421_s15, 4  ;;  %p2304_p0 = scmp.ne.s32.totalorder %s2682_s1, %s2303_s19  ;;  %s30_s16 = int_to_ptr.vmem [resolvable:$true] %s29_s16 }
   0x5   :  { %p2307_p1 = scmp.lt.u32.totalorder %s2303_s19, %s2682_s1 }
   0x7   :  { %p2309_p2 = pnand %p2307_p1, %p2304_p0 }
   0x9   :  { %2312 = shalt.err (!%p2309_p2)
}
   0xa   :  { %s2313_s24 = scalar_lea.vmem %s30_s16, 12288  ;;  %p2318_p4 = scmp.lt.s32.totalorder %s30_s16, %s30_s16 }
   0xb   :  { %p2314_p3 = scmp.ne.s32.totalorder %s30_s16, %s2313_s24  ;;  %p2319_p5 = scmp.lt.s32.totalorder %s2313_s24, %s2313_s24 }
   0xd   :  { %p2320_p6 = por %p2319_p5, %p2318_p4 }
   0xf   :  { %p2321_p7 = pnand %p2320_p6, %p2314_p3 }
  0x11   :  { %2324 = shalt.err (!%p2321_p7)
}
  0x12   :  { %s2422_s25 = smov 64   ;;  %s2423_s26 = smov 4  }
  0x13   :  { %35 = dma.hbm_to_vmem [thread:$0]  %s2682_s1, 12288, %s30_s16, [#allocation6], %s2422_s25, %s2422_s25, %s2423_s26  }
  0x14   :  { %s2424_s29 = smov [#allocation2]   ;;  %s2425_s5 = smov [#allocation7]  }
  0x15   :  { %s20_s30 = sshll.u32 %s2424_s29, 4  ;;  %s41_s6 = sshll.u32 %s2425_s5, 4  ;;  %s21_s30 = int_to_ptr.vmem [resolvable:$true] %s20_s30  ;;  %s42_s6 = int_to_ptr.vmem [resolvable:$true] %s41_s6 }
  0x16   :  { %s2325_s9 = scalar_lea.hbm %s2681_s0, 128 }
  0x17   :  { %p2326_p8 = scmp.ne.s32.totalorder %s2681_s0, %s2325_s9  ;;  %p2329_p9 = scmp.lt.u32.totalorder %s2325_s9, %s2681_s0 }
  0x19   :  { %p2331_p10 = pnand %p2329_p9, %p2326_p8 }
  0x1b   :  { %2334 = shalt.err (!%p2331_p10)
}
  0x1c   :  { %s2335_s1 = scalar_lea.vmem %s21_s30, 128  ;;  %p2340_p12 = scmp.lt.s32.totalorder %s21_s30, %s21_s30 }
  0x1d   :  { %p2336_p11 = scmp.ne.s32.totalorder %s21_s30, %s2335_s1  ;;  %p2341_p13 = scmp.lt.s32.totalorder %s2335_s1, %s2335_s1 }
  0x1f   :  { %p2342_p0 = por %p2341_p13, %p2340_p12 }
  0x21   :  { %p2343_p1 = pnand %p2342_p0, %p2336_p11 }
  0x23   :  { %2346 = shalt.err (!%p2343_p1)
}
  0x24   :  { %23 = dma.hbm_to_vmem [thread:$0]  %s2681_s0, 128, %s21_s30, [#allocation3]  }
  0x25   :  { %s2347_s18 = scalar_lea.hbm %s2683_s2, 1536 }
  0x26   :  { %p2348_p2 = scmp.ne.s32.totalorder %s2683_s2, %s2347_s18  ;;  %p2351_p3 = scmp.lt.u32.totalorder %s2347_s18, %s2683_s2 }
  0x28   :  { %p2353_p4 = pnand %p2351_p3, %p2348_p2 }
  0x2a   :  { %2356 = shalt.err (!%p2353_p4)
}
  0x2b   :  { %s2357_s23 = scalar_lea.vmem %s42_s6, 1536  ;;  %p2362_p6 = scmp.lt.s32.totalorder %s42_s6, %s42_s6 }
  0x2c   :  { %p2358_p5 = scmp.ne.s32.totalorder %s42_s6, %s2357_s23  ;;  %p2363_p7 = scmp.lt.s32.totalorder %s2357_s23, %s2357_s23 }
  0x2e   :  { %p2364_p8 = por %p2363_p7, %p2362_p6 }
  0x30   :  { %p2365_p9 = pnand %p2364_p8, %p2358_p5 }
  0x32   :  { %2368 = shalt.err (!%p2365_p9)
}
  0x33   :  { %s2426_s0 = smov 128   ;;  %s2427_s24 = smov 8  }
  0x34   :  { %47 = dma.hbm_to_vmem [thread:$0]  %s2683_s2, 1536, %s42_s6, [#allocation6], %s2426_s0, %s2426_s0, %s2427_s24  }
  0x35   :  { %2413 = dma.done.wait [#allocation3], 128  }
  0x36   :  { %2414 = vsyncadd [#allocation3], 4294967168 }
  0x37   :  { %2415 = dma.done.wait [#allocation6], 13824  }
  0x38   :  { %2416 = vsyncadd [#allocation6], 4294953472  ;;  %v2428_v0 = vmov 0.0   ;;  %vm2429_vm0 = vmmov 0   ;;  %v2171_v1 = vld [vmem:[#allocation5] sm:$0xff]   ;;  %v2172_v2 = vld [vmem:[#allocation5 + $0x8] sm:$0xff]   ;;  %v58_v40 = vlaneseq }
  0x39   :  { %1928 = vmatprep.subr.bf16.mxu0 %v2428_v0  ;;  %1936 = vmatprep.mubr.msk.bf16.mxu0 %vm2429_vm0, %v2428_v0  ;;  %v2173_v3 = vld [vmem:[#allocation5 + $0x10] sm:$0xff]   ;;  %vm99_vm1 = vcmask 523264   ;;  %v2174_v4 = vld [vmem:[#allocation5 + $0x18] sm:$0xff]   ;;  %v1700_v7 = vld [vmem:[#allocation7] ss:$0 sm:$0xff]  ;;  %vm862_vm4 = vcmask 261120  }
  0x3a   :  { %1940 = vmatprep.subr.bf16.mxu1 %v2428_v0  ;;  %1956 = vmatprep.mubr.msk.bf16.mxu1 %vm2429_vm0, %v2428_v0  ;;  %v60_v5 = vld [vmem:[#allocation2] sm:$0xff]  ;;  %v2175_v17 = vld [vmem:[#allocation5 + $0x40] sm:$0xff]   ;;  %v2176_v18 = vld [vmem:[#allocation5 + $0x48] sm:$0xff]   ;;  %v2516_v41 = vand.u32 127, %v58_v40  ;;  %s2430_s2 = smov [#allocation8]  }
  0x3b   :  { %1929 = vmatpush3.bf16.msra.mxu0 %v2171_v1  ;;  %v69_v6 = vpack.c.bf16 %v60_v5, %v60_v5  ;;  %1941 = vmatpush3.bf16.msra.mxu1 %v2175_v17  ;;  %v2177_v19 = vld [vmem:[#allocation5 + $0x50] sm:$0xff]   ;;  %v2178_v20 = vld [vmem:[#allocation5 + $0x58] sm:$0xff]   ;;  %v2179_v21 = vld [vmem:[#allocation5 + $0x60] sm:$0xff]   ;;  %s1676_s27 = sshll.u32 %s2430_s2, 4  ;;  %s1677_s27 = int_to_ptr.vmem [resolvable:$true] %s1676_s27 }
  0x3c   :  { %1930 = vmatprep.subr.bf16.mxu0 %v2428_v0  ;;  %1942 = vmatprep.subr.bf16.mxu1 %v2428_v0  ;;  %v2180_v22 = vld [vmem:[#allocation5 + $0x68] sm:$0xff]   ;;  %v2181_v23 = vld [vmem:[#allocation5 + $0x70] sm:$0xff]   ;;  %v2182_v24 = vld [vmem:[#allocation5 + $0x78] sm:$0xff]   ;;  %vm283_vm2 = vcmp.lt.s32.totalorder %v2516_v41, 64  ;;  %vm833_vm3 = vcmp.lt.s32.totalorder %v2516_v41, 32  ;;  %s2369_s28 = scalar_lea.vmem %s1677_s27, 128  ;;  %p2374_p11 = scmp.lt.s32.totalorder %s1677_s27, %s1677_s27 }
  0x3d   :  { %v1706_v29 = vld [vmem:[#allocation7 + $0x1] ss:$0 sm:$0xff]  ;;  %v1707_v31 = vld [vmem:[#allocation7 + $0x2] ss:$0 sm:$0xff]  ;;  %v1708_v42 = vld [vmem:[#allocation7 + $0x8] ss:$0 sm:$0xff]  ;;  %p2370_p10 = scmp.ne.s32.totalorder %s1677_s27, %s2369_s28  ;;  %p2375_p12 = scmp.lt.s32.totalorder %s2369_s28, %s2369_s28 }
  0x3e   :  { %v2183_v54 = vld [vmem:[#allocation5 + $0x80] sm:$0xff]   ;;  %v2184_v55 = vld [vmem:[#allocation5 + $0x88] sm:$0xff]   ;;  %v2185_v56 = vld [vmem:[#allocation5 + $0x90] sm:$0xff]  }
  0x3f   :  { %1931 = vmatpush3.bf16.msra.mxu0 %v2172_v2  ;;  %1943 = vmatpush3.bf16.msra.mxu1 %v2176_v18  ;;  %v2186_v57 = vld [vmem:[#allocation5 + $0x98] sm:$0xff]   ;;  %v2187_v58 = vld [vmem:[#allocation5 + $0xa0] sm:$0xff]   ;;  %v2188_v59 = vld [vmem:[#allocation5 + $0xa8] sm:$0xff]   ;;  %p2376_p13 = por %p2375_p12, %p2374_p11 }
  0x40   :  { %1932 = vmatprep.subr.bf16.mxu0 %v2428_v0  ;;  %1944 = vmatprep.subr.bf16.mxu1 %v2428_v0  ;;  %v2189_v60 = vld [vmem:[#allocation5 + $0xb0] sm:$0xff]   ;;  %v2190_v61 = vld [vmem:[#allocation5 + $0xb8] sm:$0xff]   ;;  %v1718_v5 = vld [vmem:[#allocation7 + $0xa] ss:$0 sm:$0xff] }
  0x41   :  { %v1729_v40 = vld [vmem:[#allocation7 + $0x12] ss:$0 sm:$0xff]  ;;  %p2377_p0 = pnand %p2376_p13, %p2370_p10 }
  0x43   :  { %1933 = vmatpush3.bf16.msra.mxu0 %v2173_v3  ;;  %1945 = vmatpush3.bf16.msra.mxu1 %v2177_v19  ;;  %v1717_v3 = vld [vmem:[#allocation7 + $0x9] ss:$0 sm:$0xff] }
  0x44   :  { %1934 = vmatprep.subr.bf16.mxu0 %v2428_v0  ;;  %1946 = vmatprep.subr.bf16.mxu1 %v2428_v0 }
  0x47   :  { %1935 = vmatpush3.bf16.msra.mxu0 %v2174_v4  ;;  %1947 = vmatpush3.bf16.msra.mxu1 %v2178_v20 }
  0x48   :  { %1960 = vmatprep.subr.bf16.mxu0 %v2428_v0  ;;  %1948 = vmatprep.subr.bf16.mxu1 %v2428_v0 }
  0x4a   :  { %1937 = vmatmul.mubr.msk.bf16.vlgmr.msra.gmra.mrb[0].mxu0 %vm99_vm1, %v69_v6 }
  0x4b   :  { %1976 = vmatprep.mubr.msk.bf16.mxu0 %vm2429_vm0, %v2428_v0  ;;  %1949 = vmatpush3.bf16.msra.mxu1 %v2179_v21 }
  0x4c   :  { %1950 = vmatprep.subr.bf16.mxu1 %v2428_v0  ;;  %1961 = vmatpush3.bf16.msra.mxu0 %v2183_v54 }
  0x4d   :  { %1962 = vmatprep.subr.bf16.mxu0 %v2428_v0 }
  0x4f   :  { %1951 = vmatpush3.bf16.msra.mxu1 %v2180_v22 }
  0x50   :  { %1952 = vmatprep.subr.bf16.mxu1 %v2428_v0  ;;  %1963 = vmatpush3.bf16.msra.mxu0 %v2184_v55 }
  0x51   :  { %1964 = vmatprep.subr.bf16.mxu0 %v2428_v0 }
  0x53   :  { %1953 = vmatpush3.bf16.msra.mxu1 %v2181_v23 }
  0x54   :  { %1954 = vmatprep.subr.bf16.mxu1 %v2428_v0  ;;  %1965 = vmatpush3.bf16.msra.mxu0 %v2185_v56 }
  0x55   :  { %1966 = vmatprep.subr.bf16.mxu0 %v2428_v0 }
  0x57   :  { %1955 = vmatpush3.bf16.msra.mxu1 %v2182_v24 }
  0x58   :  { %1980 = vmatprep.subr.bf16.mxu1 %v2428_v0  ;;  %1967 = vmatpush3.bf16.msra.mxu0 %v2186_v57  ;;  %v2199_v57 = vld [vmem:[#allocation5 + $0x100] sm:$0xff]  }
  0x59   :  { %1968 = vmatprep.subr.bf16.mxu0 %v2428_v0 }
  0x5c   :  { %1969 = vmatpush3.bf16.msra.mxu0 %v2187_v58  ;;  %v2200_v58 = vld [vmem:[#allocation5 + $0x108] sm:$0xff]  }
  0x5d   :  { %1970 = vmatprep.subr.bf16.mxu0 %v2428_v0 }
  0x60   :  { %1971 = vmatpush3.bf16.msra.mxu0 %v2188_v59 }
  0x61   :  { %1972 = vmatprep.subr.bf16.mxu0 %v2428_v0 }
  0x64   :  { %1973 = vmatpush3.bf16.msra.mxu0 %v2189_v60 }
  0x65   :  { %1974 = vmatprep.subr.bf16.mxu0 %v2428_v0 }
  0x68   :  { %1975 = vmatpush3.bf16.msra.mxu0 %v2190_v61 }
  0x69   :  { %2000 = vmatprep.subr.bf16.mxu0 %v2428_v0 }
 0x11d   :  { %v137_v8 = vpop.f32.mrb[0].mxu0 }
 0x11e   :  { %v138_v9 = vadd.f32 %v1700_v7, %v137_v8  ;;  %v1938_v10 = vpop.f32.mrb[1].mxu0 }
 0x11f   :  { %v140_v11 = vpop.f32.mrb[2].mxu0 }
 0x120   :  { %143 = vadd.xlane.f32.xlu0 %v138_v9  ;;  %v1939_v12 = vpop.f32.mrb[3].mxu0 }
 0x1ad   :  { %v144_v13 = vpop.xlane.xlu0 %143 }
 0x1ae   :  { %v145_v14 = vmul.f32 0.0078125, %v144_v13 }
 0x1b0   :  { %v146_v15 = vsub.f32 %v138_v9, %v145_v14  ;;  %v1719_v14 = vld [vmem:[#allocation7 + $0x10] ss:$0 sm:$0xff] }
 0x1b2   :  { %v147_v16 = vmul.f32 %v146_v15, %v146_v15 }
 0x1b4   :  { %148 = vadd.xlane.f32.xlu0 %v147_v16 }
 0x241   :  { %v149_v25 = vpop.xlane.xlu0 %148 }
 0x242   :  { %v150_v26 = vmul.f32 0.0078125, %v149_v25 }
 0x244   :  { %v151_v27 = vadd.f32 1e-05, %v150_v26  ;;  %v2191_v26 = vld [vmem:[#allocation5 + $0xc0] sm:$0xff]  }
 0x246   :  { %2263 = vrsqrt.f32 %v151_v27  ;;  %v2192_v27 = vld [vmem:[#allocation5 + $0xc8] sm:$0xff]  }
 0x250   :  { %v2264_v28 = vpop.eup %2263 }
 0x251   :  { %v153_v30 = vmul.f32 %v2264_v28, %v146_v15  ;;  %v2193_v28 = vld [vmem:[#allocation5 + $0xd0] sm:$0xff]  }
 0x253   :  { %v159_v32 = vmul.f32 %v1706_v29, %v153_v30  ;;  %v2194_v29 = vld [vmem:[#allocation5 + $0xd8] sm:$0xff]   ;;  %v2195_v30 = vld [vmem:[#allocation5 + $0xe0] sm:$0xff]  }
 0x255   :  { %v165_v33 = vadd.f32 %v1707_v31, %v159_v32  ;;  %v2196_v31 = vld [vmem:[#allocation5 + $0xe8] sm:$0xff]   ;;  %v2197_v32 = vld [vmem:[#allocation5 + $0xf0] sm:$0xff]  }
 0x257   :  { %v167_v34 = vmul.f32 0.70710677, %v165_v33  ;;  %v166_v36 = vmul.f32 0.5, %v165_v33  ;;  %v2198_v33 = vld [vmem:[#allocation5 + $0xf8] sm:$0xff]  }
 0x259   :  { %2265 = verf.f32 %v167_v34 }
 0x263   :  { %v2266_v35 = vpop.eup %2265 }
 0x264   :  { %v169_v37 = vadd.f32 1.0, %v2266_v35 }
 0x266   :  { %v170_v38 = vmul.f32 %v169_v37, %v166_v36 }
 0x268   :  { %v188_v39 = vpack.c.bf16 %v170_v38, %v170_v38  ;;  %v1728_v38 = vld [vmem:[#allocation7 + $0x11] ss:$0 sm:$0xff] }
 0x26a   :  { %1957 = vmatmul.mubr.bf16.vlgmr.msra.gmra.mrb[0].mxu1 %v188_v39 }
 0x26b   :  { %1996 = vmatprep.mubr.msk.bf16.mxu1 %vm2429_vm0, %v2428_v0  ;;  %1981 = vmatpush3.bf16.msra.mxu1 %v2191_v26  ;;  %v2207_v26 = vld [vmem:[#allocation5 + $0x140] sm:$0xff]  }
 0x26c   :  { %1982 = vmatprep.subr.bf16.mxu1 %v2428_v0 }
 0x26f   :  { %1983 = vmatpush3.bf16.msra.mxu1 %v2192_v27  ;;  %v2208_v27 = vld [vmem:[#allocation5 + $0x148] sm:$0xff]  }
 0x270   :  { %1984 = vmatprep.subr.bf16.mxu1 %v2428_v0 }
 0x273   :  { %1985 = vmatpush3.bf16.msra.mxu1 %v2193_v28 }
 0x274   :  { %1986 = vmatprep.subr.bf16.mxu1 %v2428_v0 }
 0x277   :  { %1987 = vmatpush3.bf16.msra.mxu1 %v2194_v29 }
 0x278   :  { %1988 = vmatprep.subr.bf16.mxu1 %v2428_v0 }
 0x27b   :  { %1989 = vmatpush3.bf16.msra.mxu1 %v2195_v30 }
 0x27c   :  { %1990 = vmatprep.subr.bf16.mxu1 %v2428_v0 }
 0x27f   :  { %1991 = vmatpush3.bf16.msra.mxu1 %v2196_v31 }
 0x280   :  { %1992 = vmatprep.subr.bf16.mxu1 %v2428_v0 }
 0x283   :  { %1993 = vmatpush3.bf16.msra.mxu1 %v2197_v32 }
 0x284   :  { %1994 = vmatprep.subr.bf16.mxu1 %v2428_v0 }
 0x287   :  { %1995 = vmatpush3.bf16.msra.mxu1 %v2198_v33  ;;  %v2210_v33 = vld [vmem:[#allocation5 + $0x158] sm:$0xff]  }
 0x288   :  { %2020 = vmatprep.subr.bf16.mxu1 %v2428_v0 }
 0x33d   :  { %v277_v43 = vpop.f32.mrb[0].mxu1 }
 0x33e   :  { %v278_v44 = vadd.f32 %v1708_v42, %v277_v43  ;;  %v1958_v45 = vpop.f32.mrb[1].mxu1 }
 0x33f   :  { %v280_v46 = vpop.f32.mrb[2].mxu1 }
 0x340   :  { %v1959_v47 = vpop.f32.mrb[3].mxu1  ;;  %v286_v48 = vsel %vm283_vm2, %v278_v44, 0.0 }
 0x341   :  { %287 = vadd.xlane.f32.xlu1 %v286_v48 }
 0x3ce   :  { %v288_v49 = vpop.xlane.xlu1 %287 }
 0x3cf   :  { %v289_v50 = vmul.f32 0.015625, %v288_v49 }
 0x3d1   :  { %v290_v51 = vsub.f32 %v278_v44, %v289_v50  ;;  %v1730_v50 = vld [vmem:[#allocation7 + $0x18] ss:$0 sm:$0xff] }
 0x3d3   :  { %v291_v52 = vsel %vm283_vm2, %v290_v51, 0.0 }
 0x3d4   :  { %v292_v53 = vmul.f32 %v291_v52, %v291_v52 }
 0x3d6   :  { %293 = vadd.xlane.f32.xlu1 %v292_v53 }
 0x463   :  { %v294_v62 = vpop.xlane.xlu1 %293 }
 0x464   :  { %v295_v63 = vmul.f32 0.015625, %v294_v62 }
 0x466   :  { %v296_v1 = vadd.f32 1e-05, %v295_v63 }
 0x468   :  { %2267 = vrsqrt.f32 %v296_v1  ;;  %v2201_v1 = vld [vmem:[#allocation5 + $0x110] sm:$0xff]  }
 0x472   :  { %v2268_v2 = vpop.eup %2267 }
 0x473   :  { %v298_v4 = vmul.f32 %v2268_v2, %v291_v52  ;;  %v2202_v2 = vld [vmem:[#allocation5 + $0x118] sm:$0xff]  }
 0x475   :  { %v304_v6 = vmul.f32 %v1717_v3, %v298_v4  ;;  %v2203_v3 = vld [vmem:[#allocation5 + $0x120] sm:$0xff]   ;;  %v2204_v4 = vld [vmem:[#allocation5 + $0x128] sm:$0xff]  }
 0x477   :  { %v310_v7 = vadd.f32 %v1718_v5, %v304_v6  ;;  %v2205_v5 = vld [vmem:[#allocation5 + $0x130] sm:$0xff]   ;;  %v2206_v6 = vld [vmem:[#allocation5 + $0x138] sm:$0xff]  }
 0x479   :  { %v312_v8 = vmul.f32 0.70710677, %v310_v7  ;;  %v311_v10 = vmul.f32 0.5, %v310_v7 }
 0x47b   :  { %2269 = verf.f32 %v312_v8 }
 0x485   :  { %v2270_v9 = vpop.eup %2269 }
 0x486   :  { %v314_v11 = vadd.f32 1.0, %v2270_v9 }
 0x488   :  { %v2531_v12 = vmul.f32 %v314_v11, %v311_v10  ;;  %v1739_v11 = vld [vmem:[#allocation7 + $0x19] ss:$0 sm:$0xff] }
 0x48a   :  { %v333_v13 = vpack.c.bf16 %v2531_v12, %v2531_v12 }
 0x48c   :  { %1977 = vmatmul.mubr.bf16.vlgmr.msra.gmra.mrb[4].mxu0 %v333_v13 }
 0x48d   :  { %2016 = vmatprep.mubr.msk.bf16.mxu0 %vm2429_vm0, %v2428_v0  ;;  %2001 = vmatpush3.bf16.msra.mxu0 %v2199_v57  ;;  %v2215_v57 = vld [vmem:[#allocation5 + $0x180] sm:$0xff]  }
 0x48e   :  { %2002 = vmatprep.subr.bf16.mxu0 %v2428_v0 }
 0x491   :  { %2003 = vmatpush3.bf16.msra.mxu0 %v2200_v58  ;;  %v2216_v58 = vld [vmem:[#allocation5 + $0x188] sm:$0xff]  }
 0x492   :  { %2004 = vmatprep.subr.bf16.mxu0 %v2428_v0 }
 0x495   :  { %2005 = vmatpush3.bf16.msra.mxu0 %v2201_v1  ;;  %v2222_v1 = vld [vmem:[#allocation5 + $0x1b8] sm:$0xff]  }
 0x496   :  { %2006 = vmatprep.subr.bf16.mxu0 %v2428_v0 }
 0x499   :  { %2007 = vmatpush3.bf16.msra.mxu0 %v2202_v2 }
 0x49a   :  { %2008 = vmatprep.subr.bf16.mxu0 %v2428_v0 }
 0x49d   :  { %2009 = vmatpush3.bf16.msra.mxu0 %v2203_v3 }
 0x49e   :  { %2010 = vmatprep.subr.bf16.mxu0 %v2428_v0 }
 0x4a1   :  { %2011 = vmatpush3.bf16.msra.mxu0 %v2204_v4 }
 0x4a2   :  { %2012 = vmatprep.subr.bf16.mxu0 %v2428_v0 }
 0x4a5   :  { %2013 = vmatpush3.bf16.msra.mxu0 %v2205_v5 }
 0x4a6   :  { %2014 = vmatprep.subr.bf16.mxu0 %v2428_v0 }
 0x4a9   :  { %2015 = vmatpush3.bf16.msra.mxu0 %v2206_v6  ;;  %v1759_v6 = vld [vmem:[#allocation7 + $0x29] ss:$0 sm:$0xff] }
 0x4aa   :  { %2040 = vmatprep.subr.bf16.mxu0 %v2428_v0 }
 0x55f   :  { %v422_v15 = vpop.f32.mrb[4].mxu0 }
 0x560   :  { %v423_v16 = vadd.f32 %v1719_v14, %v422_v15  ;;  %v1978_v17 = vpop.f32.mrb[5].mxu0  ;;  %v1740_v14 = vld [vmem:[#allocation7 + $0x1a] ss:$0 sm:$0xff] }
 0x561   :  { %v425_v18 = vpop.f32.mrb[6].mxu0 }
 0x562   :  { %v1979_v19 = vpop.f32.mrb[7].mxu0  ;;  %v428_v20 = vsel %vm283_vm2, %v423_v16, 0.0 }
 0x563   :  { %429 = vadd.xlane.f32.xlu0 %v428_v20  ;;  %v1741_v19 = vld [vmem:[#allocation7 + $0x20] ss:$0 sm:$0xff] }
 0x5f0   :  { %v430_v21 = vpop.xlane.xlu0 %429 }
 0x5f1   :  { %v431_v22 = vmul.f32 0.015625, %v430_v21 }
 0x5f3   :  { %v432_v23 = vsub.f32 %v423_v16, %v431_v22 }
 0x5f5   :  { %v433_v24 = vsel %vm283_vm2, %v432_v23, 0.0 }
 0x5f6   :  { %v434_v25 = vmul.f32 %v433_v24, %v433_v24 }
 0x5f8   :  { %435 = vadd.xlane.f32.xlu1 %v434_v25 }
 0x685   :  { %v436_v34 = vpop.xlane.xlu1 %435 }
 0x686   :  { %v437_v35 = vmul.f32 0.015625, %v436_v34  ;;  %v2211_v34 = vld [vmem:[#allocation5 + $0x160] sm:$0xff]  }
 0x688   :  { %v438_v36 = vadd.f32 1e-05, %v437_v35  ;;  %v2212_v35 = vld [vmem:[#allocation5 + $0x168] sm:$0xff]  }
 0x68a   :  { %2271 = vrsqrt.f32 %v438_v36  ;;  %v2213_v36 = vld [vmem:[#allocation5 + $0x170] sm:$0xff]  }
 0x694   :  { %v2272_v37 = vpop.eup %2271 }
 0x695   :  { %v440_v39 = vmul.f32 %v2272_v37, %v433_v24  ;;  %v2214_v37 = vld [vmem:[#allocation5 + $0x178] sm:$0xff]  }
 0x697   :  { %v446_v42 = vmul.f32 %v1728_v38, %v440_v39 }
 0x699   :  { %v452_v43 = vadd.f32 %v1729_v40, %v446_v42 }
 0x69b   :  { %v454_v44 = vmul.f32 0.70710677, %v452_v43  ;;  %v453_v46 = vmul.f32 0.5, %v452_v43 }
 0x69d   :  { %2273 = verf.f32 %v454_v44 }
 0x6a7   :  { %v2274_v45 = vpop.eup %2273 }
 0x6a8   :  { %v456_v47 = vadd.f32 1.0, %v2274_v45  ;;  %v1750_v45 = vld [vmem:[#allocation7 + $0x28] ss:$0 sm:$0xff] }
 0x6aa   :  { %v457_v48 = vmul.f32 %v456_v47, %v453_v46 }
 0x6ac   :  { %v475_v49 = vpack.c.bf16 %v457_v48, %v457_v48 }
 0x6ae   :  { %1997 = vmatmul.mubr.bf16.vlgmr.msra.gmra.mrb[4].mxu1 %v475_v49 }
 0x6af   :  { %2036 = vmatprep.mubr.msk.bf16.mxu1 %vm2429_vm0, %v2428_v0  ;;  %2021 = vmatpush3.bf16.msra.mxu1 %v2207_v26  ;;  %v2223_v26 = vld [vmem:[#allocation5 + $0x1c0] sm:$0xff]  }
 0x6b0   :  { %2022 = vmatprep.subr.bf16.mxu1 %v2428_v0 }
 0x6b3   :  { %2023 = vmatpush3.bf16.msra.mxu1 %v2208_v27  ;;  %v2224_v27 = vld [vmem:[#allocation5 + $0x1c8] sm:$0xff]  }
 0x6b4   :  { %2024 = vmatprep.subr.bf16.mxu1 %v2428_v0 }
 0x781   :  { %v564_v51 = vpop.f32.mrb[4].mxu1 }
 0x782   :  { %v565_v52 = vadd.f32 %v1730_v50, %v564_v51  ;;  %v1998_v53 = vpop.f32.mrb[5].mxu1 }
 0x783   :  { %v567_v54 = vpop.f32.mrb[6].mxu1 }
 0x784   :  { %v1999_v55 = vpop.f32.mrb[7].mxu1  ;;  %v570_v56 = vsel %vm283_vm2, %v565_v52, 0.0 }
 0x785   :  { %571 = vadd.xlane.f32.xlu0 %v570_v56 }
 0x812   :  { %v572_v59 = vpop.xlane.xlu0 %571 }
 0x813   :  { %v573_v60 = vmul.f32 0.015625, %v572_v59  ;;  %v2217_v59 = vld [vmem:[#allocation5 + $0x190] sm:$0xff]  }
 0x815   :  { %v574_v61 = vsub.f32 %v565_v52, %v573_v60  ;;  %v2218_v60 = vld [vmem:[#allocation5 + $0x198] sm:$0xff]  }
 0x817   :  { %v575_v62 = vsel %vm283_vm2, %v574_v61, 0.0  ;;  %v2219_v61 = vld [vmem:[#allocation5 + $0x1a0] sm:$0xff]  }
 0x818   :  { %v576_v63 = vmul.f32 %v575_v62, %v575_v62 }
 0x81a   :  { %577 = vadd.xlane.f32.xlu1 %v576_v63  ;;  %v2221_v63 = vld [vmem:[#allocation5 + $0x1b0] sm:$0xff]  }
 0x8a7   :  { %v578_v7 = vpop.xlane.xlu1 %577 }
 0x8a8   :  { %v579_v8 = vmul.f32 0.015625, %v578_v7 }
 0x8aa   :  { %v580_v9 = vadd.f32 1e-05, %v579_v8  ;;  %v1760_v8 = vld [vmem:[#allocation7 + $0x2a] ss:$0 sm:$0xff] }
 0x8ac   :  { %2275 = vrsqrt.f32 %v580_v9 }
 0x8b6   :  { %v2276_v10 = vpop.eup %2275 }
 0x8b7   :  { %v582_v13 = vmul.f32 %v2276_v10, %v575_v62  ;;  %v2220_v62 = vld [vmem:[#allocation5 + $0x1a8] sm:$0xff]  }
 0x8b9   :  { %v588_v15 = vmul.f32 %v1739_v11, %v582_v13 }
 0x8bb   :  { %v594_v16 = vadd.f32 %v1740_v14, %v588_v15  ;;  %v1761_v14 = vld [vmem:[#allocation7 + $0x30] ss:$0 sm:$0xff] }
 0x8bd   :  { %v595_v17 = vadd.f32 %v594_v16, %v2531_v12  ;;  %v2209_v12 = vld [vmem:[#allocation5 + $0x150] sm:$0xff]  }
 0x8be   :  { %2025 = vmatpush3.bf16.msra.mxu1 %v2209_v12  ;;  %v2225_v12 = vld [vmem:[#allocation5 + $0x1d0] sm:$0xff]  }
 0x8bf   :  { %v613_v18 = vpack.c.bf16 %v595_v17, %v595_v17  ;;  %2026 = vmatprep.subr.bf16.mxu1 %v2428_v0 }
 0x8c1   :  { %2017 = vmatmul.mubr.bf16.vlgmr.msra.gmra.mrb[8].mxu0 %v613_v18 }
 0x8c2   :  { %2056 = vmatprep.mubr.msk.bf16.mxu0 %vm2429_vm0, %v2428_v0  ;;  %2027 = vmatpush3.bf16.msra.mxu1 %v2210_v33 }
 0x8c3   :  { %2028 = vmatprep.subr.bf16.mxu1 %v2428_v0  ;;  %2041 = vmatpush3.bf16.msra.mxu0 %v2215_v57 }
 0x8c4   :  { %2042 = vmatprep.subr.bf16.mxu0 %v2428_v0 }
 0x8c6   :  { %2029 = vmatpush3.bf16.msra.mxu1 %v2211_v34 }
 0x8c7   :  { %2030 = vmatprep.subr.bf16.mxu1 %v2428_v0  ;;  %2043 = vmatpush3.bf16.msra.mxu0 %v2216_v58 }
 0x8c8   :  { %2044 = vmatprep.subr.bf16.mxu0 %v2428_v0 }
 0x8ca   :  { %2031 = vmatpush3.bf16.msra.mxu1 %v2212_v35 }
 0x8cb   :  { %2032 = vmatprep.subr.bf16.mxu1 %v2428_v0  ;;  %2045 = vmatpush3.bf16.msra.mxu0 %v2217_v59 }
 0x8cc   :  { %2046 = vmatprep.subr.bf16.mxu0 %v2428_v0 }
 0x8ce   :  { %2033 = vmatpush3.bf16.msra.mxu1 %v2213_v36 }
 0x8cf   :  { %2034 = vmatprep.subr.bf16.mxu1 %v2428_v0  ;;  %2047 = vmatpush3.bf16.msra.mxu0 %v2218_v60 }
 0x8d0   :  { %2048 = vmatprep.subr.bf16.mxu0 %v2428_v0 }
 0x8d2   :  { %2035 = vmatpush3.bf16.msra.mxu1 %v2214_v37  ;;  %v1770_v37 = vld [vmem:[#allocation7 + $0x31] ss:$0 sm:$0xff] }
 0x8d3   :  { %2060 = vmatprep.subr.bf16.mxu1 %v2428_v0  ;;  %2049 = vmatpush3.bf16.msra.mxu0 %v2219_v61  ;;  %v2231_v61 = vld [vmem:[#allocation5 + $0x200] sm:$0xff]  }
 0x8d4   :  { %2050 = vmatprep.subr.bf16.mxu0 %v2428_v0 }
 0x8d7   :  { %2051 = vmatpush3.bf16.msra.mxu0 %v2220_v62  ;;  %v2232_v62 = vld [vmem:[#allocation5 + $0x208] sm:$0xff]  }
 0x8d8   :  { %2052 = vmatprep.subr.bf16.mxu0 %v2428_v0 }
 0x8db   :  { %2053 = vmatpush3.bf16.msra.mxu0 %v2221_v63  ;;  %v2233_v63 = vld [vmem:[#allocation5 + $0x210] sm:$0xff]  }
 0x8dc   :  { %2054 = vmatprep.subr.bf16.mxu0 %v2428_v0 }
 0x8df   :  { %2055 = vmatpush3.bf16.msra.mxu0 %v2222_v1  ;;  %v2234_v1 = vld [vmem:[#allocation5 + $0x218] sm:$0xff]  }
 0x8e0   :  { %2080 = vmatprep.subr.bf16.mxu0 %v2428_v0 }
 0x994   :  { %v702_v20 = vpop.f32.mrb[8].mxu0 }
 0x995   :  { %v703_v21 = vadd.f32 %v1741_v19, %v702_v20  ;;  %v2018_v22 = vpop.f32.mrb[9].mxu0 }
 0x996   :  { %v705_v23 = vpop.f32.mrb[10].mxu0 }
 0x997   :  { %v2019_v24 = vpop.f32.mrb[11].mxu0  ;;  %v708_v25 = vsel %vm283_vm2, %v703_v21, 0.0 }
 0x998   :  { %709 = vadd.xlane.f32.xlu0 %v708_v25 }
 0xa25   :  { %v710_v28 = vpop.xlane.xlu0 %709 }
 0xa26   :  { %v711_v29 = vmul.f32 0.015625, %v710_v28  ;;  %v2226_v28 = vld [vmem:[#allocation5 + $0x1d8] sm:$0xff]  }
 0xa28   :  { %v712_v30 = vsub.f32 %v703_v21, %v711_v29  ;;  %v2227_v29 = vld [vmem:[#allocation5 + $0x1e0] sm:$0xff]  }
 0xa2a   :  { %v713_v31 = vsel %vm283_vm2, %v712_v30, 0.0  ;;  %v2228_v30 = vld [vmem:[#allocation5 + $0x1e8] sm:$0xff]  }
 0xa2b   :  { %v714_v32 = vmul.f32 %v713_v31, %v713_v31 }
 0xa2d   :  { %715 = vadd.xlane.f32.xlu1 %v714_v32  ;;  %v2230_v32 = vld [vmem:[#allocation5 + $0x1f8] sm:$0xff]  }
 0xaba   :  { %v716_v38 = vpop.xlane.xlu1 %715 }
 0xabb   :  { %v717_v39 = vmul.f32 0.015625, %v716_v38 }
 0xabd   :  { %v718_v40 = vadd.f32 1e-05, %v717_v39  ;;  %v1771_v39 = vld [vmem:[#allocation7 + $0x32] ss:$0 sm:$0xff] }
 0xabf   :  { %2277 = vrsqrt.f32 %v718_v40 }
 0xac9   :  { %v2278_v42 = vpop.eup %2277 }
 0xaca   :  { %v720_v43 = vmul.f32 %v2278_v42, %v713_v31  ;;  %v2229_v31 = vld [vmem:[#allocation5 + $0x1f0] sm:$0xff]  }
 0xacc   :  { %v738_v44 = vpack.c.bf16 %v720_v43, %v720_v43 }
 0xace   :  { %2037 = vmatmul.mubr.bf16.vlgmr.msra.gmra.mrb[8].mxu1 %v738_v44 }
 0xacf   :  { %2076 = vmatprep.mubr.msk.bf16.mxu1 %vm2429_vm0, %v2428_v0  ;;  %2061 = vmatpush3.bf16.msra.mxu1 %v2223_v26 }
 0xad0   :  { %2062 = vmatprep.subr.bf16.mxu1 %v2428_v0 }
 0xad3   :  { %2063 = vmatpush3.bf16.msra.mxu1 %v2224_v27 }
 0xad4   :  { %2064 = vmatprep.subr.bf16.mxu1 %v2428_v0 }
 0xad7   :  { %2065 = vmatpush3.bf16.msra.mxu1 %v2225_v12 }
 0xad8   :  { %2066 = vmatprep.subr.bf16.mxu1 %v2428_v0 }
 0xadb   :  { %2067 = vmatpush3.bf16.msra.mxu1 %v2226_v28  ;;  %v2239_v28 = vld [vmem:[#allocation5 + $0x240] sm:$0xff]  }
 0xadc   :  { %2068 = vmatprep.subr.bf16.mxu1 %v2428_v0 }
 0xadf   :  { %2069 = vmatpush3.bf16.msra.mxu1 %v2227_v29  ;;  %v2240_v29 = vld [vmem:[#allocation5 + $0x248] sm:$0xff]  }
 0xae0   :  { %2070 = vmatprep.subr.bf16.mxu1 %v2428_v0 }
 0xae3   :  { %2071 = vmatpush3.bf16.msra.mxu1 %v2228_v30 }
 0xae4   :  { %2072 = vmatprep.subr.bf16.mxu1 %v2428_v0 }
 0xae7   :  { %2073 = vmatpush3.bf16.msra.mxu1 %v2229_v31 }
 0xae8   :  { %2074 = vmatprep.subr.bf16.mxu1 %v2428_v0 }
 0xaeb   :  { %2075 = vmatpush3.bf16.msra.mxu1 %v2230_v32 }
 0xaec   :  { %2100 = vmatprep.subr.bf16.mxu1 %v2428_v0 }
 0xba1   :  { %v827_v46 = vpop.f32.mrb[8].mxu1 }
 0xba2   :  { %v828_v47 = vadd.f32 %v1750_v45, %v827_v46  ;;  %v2038_v48 = vpop.f32.mrb[9].mxu1 }
 0xba3   :  { %v830_v49 = vpop.f32.mrb[10].mxu1 }
 0xba4   :  { %v2039_v50 = vpop.f32.mrb[11].mxu1  ;;  %v836_v51 = vsel %vm833_vm3, %v828_v47, 0.0  ;;  %v1772_v49 = vld [vmem:[#allocation7 + $0x38] ss:$0 sm:$0xff] }
 0xba5   :  { %837 = vadd.xlane.f32.xlu0 %v836_v51 }
 0xc32   :  { %v838_v52 = vpop.xlane.xlu0 %837 }
 0xc33   :  { %v839_v53 = vmul.f32 0.03125, %v838_v52 }
 0xc35   :  { %v840_v54 = vsub.f32 %v828_v47, %v839_v53 }
 0xc37   :  { %v841_v55 = vsel %vm833_vm3, %v840_v54, 0.0 }
 0xc38   :  { %v842_v56 = vmul.f32 %v841_v55, %v841_v55 }
 0xc3a   :  { %843 = vadd.xlane.f32.xlu1 %v842_v56 }
 0xcc7   :  { %v844_v2 = vpop.xlane.xlu1 %843 }
 0xcc8   :  { %v845_v3 = vmul.f32 0.03125, %v844_v2  ;;  %v2235_v2 = vld [vmem:[#allocation5 + $0x220] sm:$0xff]  }
 0xcca   :  { %v846_v4 = vadd.f32 1e-05, %v845_v3  ;;  %v2236_v3 = vld [vmem:[#allocation5 + $0x228] sm:$0xff]  }
 0xccc   :  { %2279 = vrsqrt.f32 %v846_v4  ;;  %v2237_v4 = vld [vmem:[#allocation5 + $0x230] sm:$0xff]  }
 0xcd6   :  { %v2280_v5 = vpop.eup %2279 }
 0xcd7   :  { %v848_v7 = vmul.f32 %v2280_v5, %v841_v55  ;;  %v2238_v5 = vld [vmem:[#allocation5 + $0x238] sm:$0xff]  }
 0xcd9   :  { %v854_v9 = vmul.f32 %v1759_v6, %v848_v7 }
 0xcdb   :  { %v860_v10 = vadd.f32 %v1760_v8, %v854_v9 }
 0xcdd   :  { %2281 = vtanh.f32 %v860_v10  ;;  %v1781_v10 = vld [vmem:[#allocation7 + $0x39] ss:$0 sm:$0xff] }
 0xce7   :  { %v2282_v11 = vpop.eup %2281 }
 0xce8   :  { %v881_v13 = vpack.c.bf16 %v2282_v11, %v2282_v11  ;;  %863 = vst.msk [vmem:[#allocation8] sm:$0xff] %vm862_vm4, %v2282_v11 }
 0xcea   :  { %2057 = vmatmul.mubr.bf16.vlgmr.msra.gmra.mrb[12].mxu0 %v881_v13  ;;  %v1782_v13 = vld [vmem:[#allocation7 + $0x3a] ss:$0 sm:$0xff] }
 0xceb   :  { %2096 = vmatprep.mubr.msk.bf16.mxu0 %vm2429_vm0, %v2428_v0  ;;  %2081 = vmatpush3.bf16.msra.mxu0 %v2231_v61  ;;  %v2247_v61 = vld [vmem:[#allocation5 + $0x280] sm:$0xff]  }
 0xcec   :  { %2082 = vmatprep.subr.bf16.mxu0 %v2428_v0 }
 0xcef   :  { %2083 = vmatpush3.bf16.msra.mxu0 %v2232_v62  ;;  %v2248_v62 = vld [vmem:[#allocation5 + $0x288] sm:$0xff]  }
 0xcf0   :  { %2084 = vmatprep.subr.bf16.mxu0 %v2428_v0 }
 0xcf3   :  { %2085 = vmatpush3.bf16.msra.mxu0 %v2233_v63 }
 0xcf4   :  { %2086 = vmatprep.subr.bf16.mxu0 %v2428_v0 }
 0xcf7   :  { %2087 = vmatpush3.bf16.msra.mxu0 %v2234_v1 }
 0xcf8   :  { %2088 = vmatprep.subr.bf16.mxu0 %v2428_v0 }
 0xcfb   :  { %2089 = vmatpush3.bf16.msra.mxu0 %v2235_v2 }
 0xcfc   :  { %2090 = vmatprep.subr.bf16.mxu0 %v2428_v0 }
 0xcff   :  { %2091 = vmatpush3.bf16.msra.mxu0 %v2236_v3 }
 0xd00   :  { %2092 = vmatprep.subr.bf16.mxu0 %v2428_v0 }
 0xd03   :  { %2093 = vmatpush3.bf16.msra.mxu0 %v2237_v4 }
 0xd04   :  { %2094 = vmatprep.subr.bf16.mxu0 %v2428_v0 }
 0xd07   :  { %2095 = vmatpush3.bf16.msra.mxu0 %v2238_v5  ;;  %v2250_v5 = vld [vmem:[#allocation5 + $0x298] sm:$0xff]  }
 0xd08   :  { %2120 = vmatprep.subr.bf16.mxu0 %v2428_v0 }
 0xdbd   :  { %v970_v15 = vpop.f32.mrb[12].mxu0 }
 0xdbe   :  { %v971_v16 = vadd.f32 %v1761_v14, %v970_v15  ;;  %v2058_v17 = vpop.f32.mrb[13].mxu0 }
 0xdbf   :  { %v973_v18 = vpop.f32.mrb[14].mxu0 }
 0xdc0   :  { %v2059_v19 = vpop.f32.mrb[15].mxu0  ;;  %v976_v20 = vsel %vm283_vm2, %v971_v16, 0.0 }
 0xdc1   :  { %977 = vadd.xlane.f32.xlu0 %v976_v20 }
 0xe4e   :  { %v978_v21 = vpop.xlane.xlu0 %977 }
 0xe4f   :  { %v979_v22 = vmul.f32 0.015625, %v978_v21 }
 0xe51   :  { %v980_v23 = vsub.f32 %v971_v16, %v979_v22  ;;  %v1783_v22 = vld [vmem:[#allocation7 + $0x40] ss:$0 sm:$0xff] }
 0xe53   :  { %v981_v24 = vsel %vm283_vm2, %v980_v23, 0.0 }
 0xe54   :  { %v982_v25 = vmul.f32 %v981_v24, %v981_v24 }
 0xe56   :  { %983 = vadd.xlane.f32.xlu1 %v982_v25 }
 0xee3   :  { %v984_v33 = vpop.xlane.xlu1 %983 }
 0xee4   :  { %v985_v34 = vmul.f32 0.015625, %v984_v33 }
 0xee6   :  { %v986_v35 = vadd.f32 1e-05, %v985_v34 }
 0xee8   :  { %2283 = vrsqrt.f32 %v986_v35  ;;  %v2241_v35 = vld [vmem:[#allocation5 + $0x250] sm:$0xff]  }
 0xef2   :  { %v2284_v36 = vpop.eup %2283 }
 0xef3   :  { %v988_v38 = vmul.f32 %v2284_v36, %v981_v24  ;;  %v2242_v36 = vld [vmem:[#allocation5 + $0x258] sm:$0xff]  }
 0xef5   :  { %v994_v40 = vmul.f32 %v1770_v37, %v988_v38  ;;  %v2243_v37 = vld [vmem:[#allocation5 + $0x260] sm:$0xff]   ;;  %v2244_v38 = vld [vmem:[#allocation5 + $0x268] sm:$0xff]  }
 0xef7   :  { %v1000_v42 = vadd.f32 %v1771_v39, %v994_v40  ;;  %v2245_v39 = vld [vmem:[#allocation5 + $0x270] sm:$0xff]   ;;  %v2246_v40 = vld [vmem:[#allocation5 + $0x278] sm:$0xff]  }
 0xef9   :  { %v1002_v43 = vmul.f32 0.70710677, %v1000_v42  ;;  %v1001_v45 = vmul.f32 0.5, %v1000_v42 }
 0xefb   :  { %2285 = verf.f32 %v1002_v43 }
 0xf05   :  { %v2286_v44 = vpop.eup %2285 }
 0xf06   :  { %v1004_v46 = vadd.f32 1.0, %v2286_v44 }
 0xf08   :  { %v2603_v47 = vmul.f32 %v1004_v46, %v1001_v45  ;;  %v1792_v46 = vld [vmem:[#allocation7 + $0x41] ss:$0 sm:$0xff] }
 0xf0a   :  { %v1023_v48 = vpack.c.bf16 %v2603_v47, %v2603_v47 }
 0xf0c   :  { %2077 = vmatmul.mubr.bf16.vlgmr.msra.gmra.mrb[12].mxu1 %v1023_v48 }
 0xf0d   :  { %2116 = vmatprep.mubr.msk.bf16.mxu1 %vm2429_vm0, %v2428_v0  ;;  %2101 = vmatpush3.bf16.msra.mxu1 %v2239_v28  ;;  %v2258_v28 = vld [vmem:[#allocation5 + $0x2d8] sm:$0xff]  }
 0xf0e   :  { %2102 = vmatprep.subr.bf16.mxu1 %v2428_v0 }
 0xf11   :  { %2103 = vmatpush3.bf16.msra.mxu1 %v2240_v29  ;;  %v2259_v29 = vld [vmem:[#allocation5 + $0x2e0] sm:$0xff]  }
 0xf12   :  { %2104 = vmatprep.subr.bf16.mxu1 %v2428_v0 }
 0xf15   :  { %2105 = vmatpush3.bf16.msra.mxu1 %v2241_v35 }
 0xf16   :  { %2106 = vmatprep.subr.bf16.mxu1 %v2428_v0 }
 0xf19   :  { %2107 = vmatpush3.bf16.msra.mxu1 %v2242_v36 }
 0xf1a   :  { %2108 = vmatprep.subr.bf16.mxu1 %v2428_v0 }
 0xf1d   :  { %2109 = vmatpush3.bf16.msra.mxu1 %v2243_v37  ;;  %v1812_v37 = vld [vmem:[#allocation7 + $0x51] ss:$0 sm:$0xff] }
 0xf1e   :  { %2110 = vmatprep.subr.bf16.mxu1 %v2428_v0 }
 0xf21   :  { %2111 = vmatpush3.bf16.msra.mxu1 %v2244_v38 }
 0xf22   :  { %2112 = vmatprep.subr.bf16.mxu1 %v2428_v0 }
 0xf25   :  { %2113 = vmatpush3.bf16.msra.mxu1 %v2245_v39  ;;  %v1813_v39 = vld [vmem:[#allocation7 + $0x52] ss:$0 sm:$0xff] }
 0xf26   :  { %2114 = vmatprep.subr.bf16.mxu1 %v2428_v0 }
 0xf29   :  { %2115 = vmatpush3.bf16.msra.mxu1 %v2246_v40 }
 0xf2a   :  { %2140 = vmatprep.subr.bf16.mxu1 %v2428_v0 }
 0xfdf   :  { %v1112_v50 = vpop.f32.mrb[12].mxu1 }
 0xfe0   :  { %v1113_v51 = vadd.f32 %v1772_v49, %v1112_v50  ;;  %v2078_v52 = vpop.f32.mrb[13].mxu1  ;;  %v1793_v49 = vld [vmem:[#allocation7 + $0x42] ss:$0 sm:$0xff] }
 0xfe1   :  { %v1115_v53 = vpop.f32.mrb[14].mxu1 }
 0xfe2   :  { %v2079_v54 = vpop.f32.mrb[15].mxu1  ;;  %v1118_v55 = vsel %vm283_vm2, %v1113_v51, 0.0 }
 0xfe3   :  { %1119 = vadd.xlane.f32.xlu0 %v1118_v55  ;;  %v1794_v54 = vld [vmem:[#allocation7 + $0x48] ss:$0 sm:$0xff] }
0x1070   :  { %v1120_v56 = vpop.xlane.xlu0 %1119 }
0x1071   :  { %v1121_v57 = vmul.f32 0.015625, %v1120_v56 }
0x1073   :  { %v1122_v58 = vsub.f32 %v1113_v51, %v1121_v57 }
0x1075   :  { %v1123_v59 = vsel %vm283_vm2, %v1122_v58, 0.0 }
0x1076   :  { %v1124_v60 = vmul.f32 %v1123_v59, %v1123_v59 }
0x1078   :  { %1125 = vadd.xlane.f32.xlu1 %v1124_v60 }
0x1105   :  { %v1126_v6 = vpop.xlane.xlu1 %1125 }
0x1106   :  { %v1127_v7 = vmul.f32 0.015625, %v1126_v6  ;;  %v2251_v6 = vld [vmem:[#allocation5 + $0x2a0] sm:$0xff]  }
0x1108   :  { %v1128_v8 = vadd.f32 1e-05, %v1127_v7  ;;  %v2252_v7 = vld [vmem:[#allocation5 + $0x2a8] sm:$0xff]  }
0x110a   :  { %2287 = vrsqrt.f32 %v1128_v8  ;;  %v2253_v8 = vld [vmem:[#allocation5 + $0x2b0] sm:$0xff]  }
0x1114   :  { %v2288_v9 = vpop.eup %2287 }
0x1115   :  { %v1130_v11 = vmul.f32 %v2288_v9, %v1123_v59  ;;  %v2254_v9 = vld [vmem:[#allocation5 + $0x2b8] sm:$0xff]  }
0x1117   :  { %v1136_v14 = vmul.f32 %v1781_v10, %v1130_v11 }
0x1119   :  { %v1142_v15 = vadd.f32 %v1782_v13, %v1136_v14 }
0x111b   :  { %v1144_v16 = vmul.f32 0.70710677, %v1142_v15  ;;  %v1143_v18 = vmul.f32 0.5, %v1142_v15 }
0x111d   :  { %2289 = verf.f32 %v1144_v16  ;;  %v1803_v16 = vld [vmem:[#allocation7 + $0x50] ss:$0 sm:$0xff] }
0x1127   :  { %v2290_v17 = vpop.eup %2289 }
0x1128   :  { %v1146_v19 = vadd.f32 1.0, %v2290_v17 }
0x112a   :  { %v1147_v20 = vmul.f32 %v1146_v19, %v1143_v18 }
0x112c   :  { %v1165_v21 = vpack.c.bf16 %v1147_v20, %v1147_v20 }
0x112e   :  { %2097 = vmatmul.mubr.bf16.vlgmr.msra.gmra.mrb[16].mxu0 %v1165_v21 }
0x112f   :  { %2136 = vmatprep.mubr.msk.bf16.mxu0 %vm2429_vm0, %v2428_v0  ;;  %2121 = vmatpush3.bf16.msra.mxu0 %v2247_v61 }
0x1130   :  { %2122 = vmatprep.subr.bf16.mxu0 %v2428_v0 }
0x1133   :  { %2123 = vmatpush3.bf16.msra.mxu0 %v2248_v62 }
0x1134   :  { %2124 = vmatprep.subr.bf16.mxu0 %v2428_v0 }
0x1201   :  { %v1254_v23 = vpop.f32.mrb[16].mxu0 }
0x1202   :  { %v1255_v24 = vadd.f32 %v1783_v22, %v1254_v23  ;;  %v2098_v25 = vpop.f32.mrb[17].mxu0 }
0x1203   :  { %v1257_v26 = vpop.f32.mrb[18].mxu0 }
0x1204   :  { %v2099_v27 = vpop.f32.mrb[19].mxu0  ;;  %v1260_v12 = vsel %vm283_vm2, %v1255_v24, 0.0  ;;  %v2255_v26 = vld [vmem:[#allocation5 + $0x2c0] sm:$0xff]  }
0x1205   :  { %1261 = vadd.xlane.f32.xlu0 %v1260_v12  ;;  %v2256_v27 = vld [vmem:[#allocation5 + $0x2c8] sm:$0xff]   ;;  %v2257_v12 = vld [vmem:[#allocation5 + $0x2d0] sm:$0xff]  }
0x1292   :  { %v1262_v30 = vpop.xlane.xlu0 %1261 }
0x1293   :  { %v1263_v31 = vmul.f32 0.015625, %v1262_v30  ;;  %v2260_v30 = vld [vmem:[#allocation5 + $0x2e8] sm:$0xff]  }
0x1295   :  { %v1264_v32 = vsub.f32 %v1255_v24, %v1263_v31  ;;  %v2261_v31 = vld [vmem:[#allocation5 + $0x2f0] sm:$0xff]  }
0x1297   :  { %v1265_v33 = vsel %vm283_vm2, %v1264_v32, 0.0  ;;  %v2262_v32 = vld [vmem:[#allocation5 + $0x2f8] sm:$0xff]  }
0x1298   :  { %v1266_v34 = vmul.f32 %v1265_v33, %v1265_v33 }
0x129a   :  { %1267 = vadd.xlane.f32.xlu1 %v1266_v34 }
0x1327   :  { %v1268_v42 = vpop.xlane.xlu1 %1267 }
0x1328   :  { %v1269_v43 = vmul.f32 0.015625, %v1268_v42 }
0x132a   :  { %v1270_v44 = vadd.f32 1e-05, %v1269_v43 }
0x132c   :  { %2291 = vrsqrt.f32 %v1270_v44 }
0x1336   :  { %v2292_v45 = vpop.eup %2291 }
0x1337   :  { %v1272_v48 = vmul.f32 %v2292_v45, %v1265_v33 }
0x1339   :  { %v1278_v50 = vmul.f32 %v1792_v46, %v1272_v48 }
0x133b   :  { %v1284_v51 = vadd.f32 %v1793_v49, %v1278_v50 }
0x133d   :  { %v1285_v52 = vadd.f32 %v1284_v51, %v2603_v47  ;;  %v2249_v47 = vld [vmem:[#allocation5 + $0x290] sm:$0xff]  }
0x133e   :  { %2125 = vmatpush3.bf16.msra.mxu0 %v2249_v47 }
0x133f   :  { %v1303_v53 = vpack.c.bf16 %v1285_v52, %v1285_v52  ;;  %2126 = vmatprep.subr.bf16.mxu0 %v2428_v0 }
0x1341   :  { %2117 = vmatmul.mubr.bf16.vlgmr.msra.gmra.mrb[16].mxu1 %v1303_v53 }
0x1342   :  { %2156 = vmatprep.mubr.msk.bf16.mxu1 %vm2429_vm0, %v2428_v0  ;;  %2127 = vmatpush3.bf16.msra.mxu0 %v2250_v5 }
0x1343   :  { %2128 = vmatprep.subr.bf16.mxu0 %v2428_v0  ;;  %2141 = vmatpush3.bf16.msra.mxu1 %v2255_v26 }
0x1344   :  { %2142 = vmatprep.subr.bf16.mxu1 %v2428_v0 }
0x1346   :  { %2129 = vmatpush3.bf16.msra.mxu0 %v2251_v6 }
0x1347   :  { %2130 = vmatprep.subr.bf16.mxu0 %v2428_v0  ;;  %2143 = vmatpush3.bf16.msra.mxu1 %v2256_v27 }
0x1348   :  { %2144 = vmatprep.subr.bf16.mxu1 %v2428_v0 }
0x134a   :  { %2131 = vmatpush3.bf16.msra.mxu0 %v2252_v7 }
0x134b   :  { %2132 = vmatprep.subr.bf16.mxu0 %v2428_v0  ;;  %2145 = vmatpush3.bf16.msra.mxu1 %v2257_v12 }
0x134c   :  { %2146 = vmatprep.subr.bf16.mxu1 %v2428_v0 }
0x134e   :  { %2133 = vmatpush3.bf16.msra.mxu0 %v2253_v8 }
0x134f   :  { %2134 = vmatprep.subr.bf16.mxu0 %v2428_v0  ;;  %2147 = vmatpush3.bf16.msra.mxu1 %v2258_v28 }
0x1350   :  { %2148 = vmatprep.subr.bf16.mxu1 %v2428_v0 }
0x1352   :  { %2135 = vmatpush3.bf16.msra.mxu0 %v2254_v9 }
0x1353   :  { %2149 = vmatpush3.bf16.msra.mxu1 %v2259_v29 }
0x1354   :  { %2150 = vmatprep.subr.bf16.mxu1 %v2428_v0 }
0x1357   :  { %2151 = vmatpush3.bf16.msra.mxu1 %v2260_v30 }
0x1358   :  { %2152 = vmatprep.subr.bf16.mxu1 %v2428_v0 }
0x135b   :  { %2153 = vmatpush3.bf16.msra.mxu1 %v2261_v31 }
0x135c   :  { %2154 = vmatprep.subr.bf16.mxu1 %v2428_v0 }
0x135f   :  { %2155 = vmatpush3.bf16.msra.mxu1 %v2262_v32 }
0x1414   :  { %v1392_v55 = vpop.f32.mrb[16].mxu1 }
0x1415   :  { %v1393_v56 = vadd.f32 %v1794_v54, %v1392_v55  ;;  %v2118_v57 = vpop.f32.mrb[17].mxu1 }
0x1416   :  { %v1395_v58 = vpop.f32.mrb[18].mxu1 }
0x1417   :  { %v2119_v59 = vpop.f32.mrb[19].mxu1  ;;  %v1398_v60 = vsel %vm283_vm2, %v1393_v56, 0.0 }
0x1418   :  { %1399 = vadd.xlane.f32.xlu0 %v1398_v60 }
0x14a5   :  { %v1400_v63 = vpop.xlane.xlu0 %1399 }
0x14a6   :  { %v1401_v1 = vmul.f32 0.015625, %v1400_v63 }
0x14a8   :  { %v1402_v2 = vsub.f32 %v1393_v56, %v1401_v1 }
0x14aa   :  { %v1403_v3 = vsel %vm283_vm2, %v1402_v2, 0.0 }
0x14ab   :  { %v1404_v4 = vmul.f32 %v1403_v3, %v1403_v3 }
0x14ad   :  { %1405 = vadd.xlane.f32.xlu1 %v1404_v4 }
0x153a   :  { %v1406_v41 = vpop.xlane.xlu1 %1405 }
0x153b   :  { %v1407_v10 = vmul.f32 0.015625, %v1406_v41 }
0x153d   :  { %v1408_v11 = vadd.f32 1e-05, %v1407_v10 }
0x153f   :  { %2293 = vrsqrt.f32 %v1408_v11 }
0x1549   :  { %v2294_v13 = vpop.eup %2293 }
0x154a   :  { %v1410_v14 = vmul.f32 %v2294_v13, %v1403_v3 }
0x154c   :  { %v1428_v15 = vpack.c.bf16 %v1410_v14, %v1410_v14 }
0x154e   :  { %2137 = vmatmul.mubr.bf16.vlgmr.msra.gmra.mrb[20].mxu0 %v1428_v15 }
0x1621   :  { %v1517_v17 = vpop.f32.mrb[20].mxu0 }
0x1622   :  { %v1518_v18 = vadd.f32 %v1803_v16, %v1517_v17  ;;  %v2138_v19 = vpop.f32.mrb[21].mxu0 }
0x1623   :  { %v1520_v20 = vpop.f32.mrb[22].mxu0 }
0x1624   :  { %1523 = vadd.xlane.f32.xlu0 %v1518_v18  ;;  %v2139_v21 = vpop.f32.mrb[23].mxu0 }
0x16b1   :  { %v1524_v22 = vpop.xlane.xlu0 %1523 }
0x16b2   :  { %v1525_v23 = vmul.f32 0.0078125, %v1524_v22 }
0x16b4   :  { %v1526_v24 = vsub.f32 %v1518_v18, %v1525_v23 }
0x16b6   :  { %v1527_v25 = vmul.f32 %v1526_v24, %v1526_v24 }
0x16b8   :  { %1528 = vadd.xlane.f32.xlu1 %v1527_v25 }
0x1745   :  { %v1529_v33 = vpop.xlane.xlu1 %1528 }
0x1746   :  { %v1530_v34 = vmul.f32 0.0078125, %v1529_v33 }
0x1748   :  { %v1531_v35 = vadd.f32 1e-05, %v1530_v34 }
0x174a   :  { %2295 = vrsqrt.f32 %v1531_v35 }
0x1754   :  { %v2296_v36 = vpop.eup %2295 }
0x1755   :  { %v1533_v38 = vmul.f32 %v2296_v36, %v1526_v24 }
0x1757   :  { %v1539_v40 = vmul.f32 %v1812_v37, %v1533_v38 }
0x1759   :  { %v1545_v42 = vadd.f32 %v1813_v39, %v1539_v40 }
0x175b   :  { %v1547_v43 = vmul.f32 0.70710677, %v1545_v42  ;;  %v1546_v45 = vmul.f32 0.5, %v1545_v42 }
0x175d   :  { %2297 = verf.f32 %v1547_v43 }
0x1767   :  { %v2298_v44 = vpop.eup %2297 }
0x1768   :  { %v1549_v46 = vadd.f32 1.0, %v2298_v44 }
0x176a   :  { %v1550_v48 = vmul.f32 %v1549_v46, %v1546_v45 }
0x176c   :  { %v1568_v49 = vpack.c.bf16 %v1550_v48, %v1550_v48 }
0x176e   :  { %2157 = vmatmul.mubr.bf16.vlgmr.msra.gmra.mrb[20].mxu1 %v1568_v49 }
0x176f   :  { %2380 = shalt.err (!%p2377_p0)
}
0x1770   :  { %s2381_s5 = scalar_lea.hbm %s2684_s3, 128 }
0x1771   :  { %p2382_p1 = scmp.ne.s32.totalorder %s2684_s3, %s2381_s5  ;;  %p2385_p2 = scmp.lt.u32.totalorder %s2381_s5, %s2684_s3 }
0x1773   :  { %p2387_p3 = pnand %p2385_p2, %p2382_p1 }
0x1775   :  { %2390 = shalt.err (!%p2387_p3)
}
0x1776   :  { %1679 = dma.vmem_to_hbm [thread:$0]  %s1677_s27, 128, %s2684_s3, [#allocation4]   ;;  %v1814_v0 = vld [vmem:[#allocation7 + $0x58] ss:$0 sm:$0xff] }
0x1777   :  { %s2431_s12 = smov [#allocation9]  }
0x1778   :  { %s1686_s13 = sshll.u32 %s2431_s12, 4  ;;  %s1687_s13 = int_to_ptr.vmem [resolvable:$true] %s1686_s13 }
0x1779   :  { %s2391_s1 = scalar_lea.vmem %s1687_s13, 128  ;;  %p2396_p5 = scmp.lt.s32.totalorder %s1687_s13, %s1687_s13 }
0x177a   :  { %p2392_p4 = scmp.ne.s32.totalorder %s1687_s13, %s2391_s1  ;;  %p2397_p6 = scmp.lt.s32.totalorder %s2391_s1, %s2391_s1 }
0x177c   :  { %p2398_p7 = por %p2397_p6, %p2396_p5 }
0x177e   :  { %p2399_p8 = pnand %p2398_p7, %p2392_p4 }
0x1841   :  { %v1657_v50 = vpop.f32.mrb[20].mxu1 }
0x1842   :  { %v1658_v51 = vadd.f32 %v1814_v0, %v1657_v50  ;;  %v2158_v52 = vpop.f32.mrb[21].mxu1 }
0x1843   :  { %v1660_v53 = vpop.f32.mrb[22].mxu1 }
0x1844   :  { %v1823_v54 = vmul.f32 -1.442695, %v1658_v51  ;;  %v2159_v55 = vpop.f32.mrb[23].mxu1 }
0x1846   :  { %2299 = vpow2.f32 %v1823_v54 }
0x1850   :  { %v2300_v56 = vpop.eup %2299 }
0x1851   :  { %v1666_v57 = vadd.f32 1.0, %v2300_v56 }
0x1853   :  { %2301 = vrcp.f32 %v1666_v57 }
0x185d   :  { %v2302_v58 = vpop.eup %2301 }
0x185e   :  { %1669 = vst.msk [vmem:[#allocation9] sm:$0xff] %vm99_vm1, %v2302_v58 }
0x185f   :  { %2402 = shalt.err (!%p2399_p8)
}
0x1860   :  { %s2403_s15 = scalar_lea.hbm %s2685_s4, 128 }
0x1861   :  { %p2404_p9 = scmp.ne.s32.totalorder %s2685_s4, %s2403_s15  ;;  %p2407_p10 = scmp.lt.u32.totalorder %s2403_s15, %s2685_s4 }
0x1863   :  { %p2409_p11 = pnand %p2407_p10, %p2404_p9 }
0x1865   :  { %2412 = shalt.err (!%p2409_p11)
}
0x1866   :  { %1689 = dma.vmem_to_hbm [thread:$0]  %s1687_s13, 128, %s2685_s4, [#allocation10]  }
0x1867   :  { %2417 = dma.done.wait [#allocation4], 128  }
0x1868   :  { %2418 = vsyncadd [#allocation4], 4294967168 }
0x1869   :  { %2419 = dma.done.wait [#allocation10], 128  }
0x186a   :  { %2420 = vsyncadd [#allocation10], 4294967168 }
0x186b   :  { %1696 = vsyncpa [#allocation3], 1 }
0x186c   :  { %1697 = vsyncpa [#allocation6], 1 }
0x186d   :  { %1698 = vsyncpa [#allocation4], 1 }
0x186e   :  { %1699 = vsyncpa [#allocation10], 1 }

</bundles_post_ra>
